<compile_context>
chip_gen: v6e
topology: v6e:2x2x1
jax: 0.10.0
libtpu: 0.0.40
codegen_flags: <defaults>
</compile_context>

<pallas_src>
import jax
import jax.numpy as jnp
from jax.experimental import pallas as pl
from jax.experimental.pallas import tpu as pltpu


TB = 16       # graphs per grid step (batched path); capped at 16 per review
LANE = 128    # pad the tiny num_outputs dim up to a full lane tile


# ---------------------------------------------------------------------------
# Fused Pallas kernel: GCN x2 + (flatten fused into Linear1) + MLP head.
# One invocation handles `tb = o_ref.shape[0]` graphs.
# ---------------------------------------------------------------------------
def fused_model_kernel(a_ref, x_ref, gcn_ref, l1w_ref, lb_ref, l2w_ref, o_ref):
    f32 = jnp.float32
    bf16 = jnp.bfloat16

    a = a_ref[0]                    # (N*tb, N*tb) bf16 striped normalized adjacency
    x = x_ref[0]                    # (N*tb, F)    bf16, node-major / graph-minor rows
    tb = o_ref.shape[0]
    out_pad = o_ref.shape[1]
    n_nodes = l1w_ref.shape[0]      # N
    hid = l1w_ref.shape[1]          # H
    middle = l1w_ref.shape[2]       # N * H
    f_in = x.shape[1]

    # Small GCN params packed along sublanes: [w1; w2; b1; b2] (f32).
    w1 = gcn_ref[0:f_in, :].astype(bf16)                    # (F, H)
    w2 = gcn_ref[f_in:f_in + hid, :].astype(bf16)           # (H, H)
    b1 = gcn_ref[f_in + hid:f_in + hid + 1, :]              # (1, H) f32
    b2 = gcn_ref[f_in + hid + 1:f_in + hid + 2, :]          # (1, H) f32

    # ---- GCN layer 1: relu(A_hat @ (X @ W1) + b1) ------------------------------
    xw1 = jnp.dot(x, w1, preferred_element_type=f32)
    h1 = jnp.dot(a, xw1.astype(bf16), preferred_element_type=f32) + b1
    h1 = jnp.maximum(h1, 0.0)

    # ---- GCN layer 2: relu(A_hat @ (H1 @ W2) + b2) -----------------------------
    xw2 = jnp.dot(h1.astype(bf16), w2, preferred_element_type=f32)
    h2 = jnp.dot(a, xw2.astype(bf16), preferred_element_type=f32) + b2
    h2 = jnp.maximum(h2, 0.0).astype(bf16)                  # (N*tb, H) bf16, cast once

    # ---- Flatten(start_dim=0) fused into Linear1 as a K-split accumulation -----
    # flat[b, n*H + h] == h2[n*tb + b, h]  =>  z1[b,:] = sum_n h2[n*tb:(n+1)*tb,:] @ W1[n]
    # (contiguous sublane slices + MXU matmuls only; no lane concatenate/relayout)
    z1 = jnp.zeros((tb, middle), f32)
    for n in range(n_nodes):
        z1 = z1 + jnp.dot(h2[n * tb:(n + 1) * tb, :], l1w_ref[n],
                          preferred_element_type=f32)
    z1 = jnp.maximum(z1 + lb_ref[0:1, 0:middle], 0.0)

    # ---- Linear2 + sigmoid (lane-dense 128-wide padded output) -----------------
    z2 = jnp.dot(z1.astype(bf16), l2w_ref[...], preferred_element_type=f32)
    o_ref[...] = jax.nn.sigmoid(z2 + lb_ref[1:2, 0:out_pad])


# ---------------------------------------------------------------------------
# Plain-JAX glue: packing, striping (built directly in bf16), padding, params.
# ---------------------------------------------------------------------------
def _replicated_spec(arr):
    nd = arr.ndim
    return pl.BlockSpec(arr.shape, lambda i, _nd=nd: (0,) * _nd)


def _pack_node_major(x_b, tb, dtype):
    """(G*tb, N, F) -> (G, N*tb, F) with row n*tb + b = graph b, node n."""
    g = x_b.shape[0] // tb
    n, f = x_b.shape[1], x_b.shape[2]
    xb = x_b.astype(dtype)
    return jnp.transpose(xb.reshape(g, tb, n, f), (0, 2, 1, 3)).reshape(g, n * tb, f)


def _striped_adjacency(a_b, tb, dtype):
    """(G*tb, N, N) -> (G, N*tb, N*tb), built directly in `dtype` (bf16):
    A_str[g, n*tb+b, m*tb+c] = A[g*tb+b, n, m] * (b == c)."""
    g = a_b.shape[0] // tb
    n = a_b.shape[1]
    a4 = jnp.transpose(a_b.astype(dtype).reshape(g, tb, n, n), (0, 2, 1, 3))  # (G,N,tb,N)
    eye = jnp.eye(tb, dtype=dtype)
    a6 = jnp.einsum('gnbm,bc->gnbmc', a4, eye)                                # (G,N,tb,N,tb)
    return a6.reshape(g, n * tb, n * tb)


@jax.jit
def _fused_forward(params, x_b, a_hat_b):
    """Batched forward: x_b (B, N, F) f32, a_hat_b (B, N, N) f32 -> (B, num_outputs)."""
    bf16 = jnp.bfloat16
    f32 = jnp.float32
    b, n, f = x_b.shape
    hid = params["gcn_w1"].shape[1]
    middle = n * hid
    num_outputs = params["lin2_w"].shape[1]
    out_pad = ((num_outputs + LANE - 1) // LANE) * LANE
    lb_w = max(middle, out_pad)

    # Single-graph fast path: tb=1 -> no striping inflation, no batch padding.
    tb = 1 if b == 1 else TB
    b_pad = ((b + tb - 1) // tb) * tb
    if b_pad != b:
        x_b = jnp.pad(x_b, ((0, b_pad - b), (0, 0), (0, 0)))
        a_hat_b = jnp.pad(a_hat_b, ((0, b_pad - b), (0, 0), (0, 0)))
    g = b_pad // tb
    rows = n * tb

    x_rows = _pack_node_major(x_b, tb, bf16)          # (G, rows, F)   bf16
    a_str = _striped_adjacency(a_hat_b, tb, bf16)     # (G, rows, rows) bf16

    # Pack tiny replicated params: [w1; w2; b1; b2] along sublanes (f32).
    gcn_pack = jnp.concatenate(
        [params["gcn_w1"], params["gcn_w2"], params["gcn_b1"], params["gcn_b2"]],
        axis=0).astype(f32)                           # (F + H + 2, H)
    # Linear biases packed: row 0 = lin1_b, row 1 = lin2_b (lane padded).
    l1b = jnp.pad(params["lin1_b"], ((0, 0), (0, lb_w - middle)))
    l2b = jnp.pad(params["lin2_b"], ((0, 0), (0, lb_w - num_outputs)))
    lb_pack = jnp.concatenate([l1b, l2b], axis=0).astype(f32)      # (2, lb_w)

    # Linear1 weight as (N, H, middle) slabs so the K-split can index its
    # leading dim with no sub-tile slicing.
    l1w3 = params["lin1_w"].reshape(n, hid, middle).astype(bf16)
    l2w = jnp.pad(params["lin2_w"],
                  ((0, 0), (0, out_pad - num_outputs))).astype(bf16)

    flops = g * 2 * (rows * f * hid + rows * rows * hid
                     + rows * hid * hid + rows * rows * hid
                     + tb * middle * middle + tb * middle * out_pad)
    bytes_accessed = (a_str.size * 2 + x_rows.size * 2 + gcn_pack.size * 4
                      + l1w3.size * 2 + lb_pack.size * 4 + l2w.size * 2
                      + b_pad * out_pad * 4)
    cost = pl.CostEstimate(flops=int(flops),
                           transcendentals=int(b_pad * out_pad),
                           bytes_accessed=int(bytes_accessed))

    out = pl.pallas_call(
        fused_model_kernel,
        out_shape=jax.ShapeDtypeStruct((b_pad, out_pad), jnp.float32),
        grid=(g,),
        in_specs=[
            pl.BlockSpec((1, rows, rows), lambda i: (i, 0, 0)),
            pl.BlockSpec((1, rows, f), lambda i: (i, 0, 0)),
            _replicated_spec(gcn_pack),
            _replicated_spec(l1w3),
            _replicated_spec(lb_pack),
            _replicated_spec(l2w),
        ],
        out_specs=pl.BlockSpec((tb, out_pad), lambda i: (i, 0)),
        compiler_params=pltpu.CompilerParams(
            dimension_semantics=("parallel",)),   # v7x: batch blocks across its 2 TCs
        cost_estimate=cost,
    )(a_str, x_rows, gcn_pack, l1w3, lb_pack, l2w)

    return out[:b, :num_outputs]


# ---------------------------------------------------------------------------
# Model-level API (matches BaseModel.forward semantics)
# ---------------------------------------------------------------------------
def normalized_adjacency(edge_index, num_nodes):
    """Dense GCN normalization: A_hat = D^-1/2 (A + I) D^-1/2 (self-loops added)."""
    src, dst = edge_index[0], edge_index[1]
    a = jnp.zeros((num_nodes, num_nodes), jnp.float32).at[dst, src].add(1.0)
    a = a + jnp.eye(num_nodes, dtype=jnp.float32)
    deg = jnp.sum(a, axis=1)
    dinv = jnp.where(deg > 0, 1.0 / jnp.sqrt(deg), 0.0)
    return dinv[:, None] * a * dinv[None, :]


def base_model_forward(params, x, edge_index):
    """Single-graph forward, equivalent to BaseModel.forward(x, edge). Uses tb=1 fast path."""
    a_hat = normalized_adjacency(edge_index, x.shape[0])
    return _fused_forward(params, x[None], a_hat[None])[0]


def base_model_forward_batched(params, x_b, a_hat_b):
    """Throughput path: B graphs per call through the same fused kernel (TB=16/step)."""
    return _fused_forward(params, x_b, a_hat_b)


def init_params(key, max_atoms, in_features, hidden_features, num_outputs):
    ks = jax.random.split(key, 6)
    middle = max_atoms * hidden_features
    return {
        # GCNConv weights stored as (in, out); bias (1, out)
        "gcn_w1": 0.1 * jax.random.normal(ks[0], (in_features, hidden_features), jnp.float32),
        "gcn_b1": jnp.zeros((1, hidden_features), jnp.float32),
        "gcn_w2": 0.1 * jax.random.normal(ks[1], (hidden_features, hidden_features), jnp.float32),
        "gcn_b2": jnp.zeros((1, hidden_features), jnp.float32),
        # nn.Linear weights are (out, in) in torch; stored transposed (in, out)
        "lin1_w": 0.05 * jax.random.normal(ks[2], (middle, middle), jnp.float32),
        "lin1_b": 0.01 * jax.random.normal(ks[3], (1, middle), jnp.float32),
        "lin2_w": 0.05 * jax.random.normal(ks[4], (middle, num_outputs), jnp.float32),
        "lin2_b": 0.01 * jax.random.normal(ks[5], (1, num_outputs), jnp.float32),
    }


def _reference_forward(params, x, a_hat):
    """Pure-JAX f32 reference of BaseModel.forward for one graph."""
    h = jax.nn.relu(a_hat @ (x @ params["gcn_w1"]) + params["gcn_b1"])
    h = jax.nn.relu(a_hat @ (h @ params["gcn_w2"]) + params["gcn_b2"])
    flat = h.reshape(1, -1)
    z1 = jax.nn.relu(flat @ params["lin1_w"] + params["lin1_b"])
    z2 = z1 @ params["lin2_w"] + params["lin2_b"]
    return jax.nn.sigmoid(z2)[0]


if __name__ == "__main__":
    MAX_ATOMS = 32
    IN_FEATURES = 8
    HIDDEN_FEATURES = 8
    NUM_OUTPUTS = 5

    key = jax.random.PRNGKey(0)
    kp, kx, kb = jax.random.split(key, 3)
    params = init_params(kp, MAX_ATOMS, IN_FEATURES, HIDDEN_FEATURES, NUM_OUTPUTS)

    # Node features, shape (max_atoms, in_features).
    x = jax.random.uniform(kx, (MAX_ATOMS, IN_FEATURES), jnp.float32)

    # Simple undirected chain graph as edge_index (2, E).
    n_edges = MAX_ATOMS - 1
    src = jnp.arange(n_edges, dtype=jnp.int32)
    dst = src + 1
    edge_index = jnp.stack([jnp.concatenate([src, dst]),
                            jnp.concatenate([dst, src])], axis=0)

    # Single-graph forward (BaseModel.forward semantics) -> tb=1 fast path.
    out = jax.block_until_ready(base_model_forward(params, x, edge_index))
    assert out.shape == (NUM_OUTPUTS,)
    assert bool(jnp.all((out > 0.0) & (out < 1.0)))

    a_hat = normalized_adjacency(edge_index, MAX_ATOMS)
    ref = _reference_forward(params, x, a_hat)
    assert bool(jnp.max(jnp.abs(out - ref)) < 5e-2)

    # Batched throughput path: 32 graphs -> grid of 2 "parallel" TB=16 blocks.
    B = 32
    xb = jax.random.uniform(kb, (B, MAX_ATOMS, IN_FEATURES), jnp.float32)
    ab = jnp.broadcast_to(a_hat, (B, MAX_ATOMS, MAX_ATOMS))
    out_b = jax.block_until_ready(base_model_forward_batched(params, xb, ab))
    ref_b = jax.vmap(lambda xi: _reference_forward(params, xi, a_hat))(xb)
    assert out_b.shape == (B, NUM_OUTPUTS)
    assert bool(jnp.all((out_b > 0.0) & (out_b < 1.0)))
    assert bool(jnp.max(jnp.abs(out_b - ref_b)) < 5e-2)

    # Partial-batch path (padding + un-pad slice): 10 graphs -> one TB=16 block.
    out_p = jax.block_until_ready(base_model_forward_batched(params, xb[:10], ab[:10]))
    assert out_p.shape == (10, NUM_OUTPUTS)
    assert bool(jnp.max(jnp.abs(out_p - ref_b[:10])) < 5e-2)

    print("KERNEL_OK")
</pallas_src>

<mosaic_0001>
module attributes {stable_mosaic.version = 11 : i64} {
  func.func @fused_model_kernel(%arg0: i32, %arg1: memref<1x32x32xbf16, #tpu.memory_space<vmem>>, %arg2: memref<1x32x8xbf16, #tpu.memory_space<vmem>>, %arg3: memref<18x8xf32, #tpu.memory_space<vmem>>, %arg4: memref<32x8x256xbf16, #tpu.memory_space<vmem>>, %arg5: memref<2x256xf32, #tpu.memory_space<vmem>>, %arg6: memref<256x128xbf16, #tpu.memory_space<vmem>>, %arg7: memref<1x128xf32, #tpu.memory_space<vmem>>) attributes {dimension_semantics = [#tpu.dimension_semantics<parallel>], iteration_bounds = array<i64: 1>, scalar_prefetch = 0 : i64, scratch_operands = 0 : i64, tpu.core_type = #tpu.core_type<tc>, window_params = [{transform_indices = @transform_0, window_bounds = array<i64: 1, 32, 32>}, {transform_indices = @transform_1, window_bounds = array<i64: 1, 32, 8>}, {pipeline_mode = #tpu.pipeline_mode<synchronous>, transform_indices = @transform_2, window_bounds = array<i64: 18, 8>}, {pipeline_mode = #tpu.pipeline_mode<synchronous>, transform_indices = @transform_3, window_bounds = array<i64: 32, 8, 256>}, {pipeline_mode = #tpu.pipeline_mode<synchronous>, transform_indices = @transform_4, window_bounds = array<i64: 2, 256>}, {pipeline_mode = #tpu.pipeline_mode<synchronous>, transform_indices = @transform_5, window_bounds = array<i64: 256, 128>}, {transform_indices = @transform_6, window_bounds = array<i64: 1, 128>}]} {
    %c0 = arith.constant 0 : index
    %c0_0 = arith.constant 0 : index
    %c0_1 = arith.constant 0 : index
    %0 = vector.load %arg1[%c0, %c0_0, %c0_1] : memref<1x32x32xbf16, #tpu.memory_space<vmem>>, vector<1x32x32xbf16>
    %1 = vector.shape_cast %0 : vector<1x32x32xbf16> to vector<32x32xbf16>
    %c0_2 = arith.constant 0 : index
    %c0_3 = arith.constant 0 : index
    %c0_4 = arith.constant 0 : index
    %2 = vector.load %arg2[%c0_2, %c0_3, %c0_4] : memref<1x32x8xbf16, #tpu.memory_space<vmem>>, vector<1x32x8xbf16>
    %3 = vector.shape_cast %2 : vector<1x32x8xbf16> to vector<32x8xbf16>
    %c0_5 = arith.constant 0 : index
    %c0_6 = arith.constant 0 : index
    %4 = vector.load %arg3[%c0_5, %c0_6] : memref<18x8xf32, #tpu.memory_space<vmem>>, vector<8x8xf32>
    %5 = arith.truncf %4 : vector<8x8xf32> to vector<8x8xbf16>
    %c8 = arith.constant 8 : index
    %c0_7 = arith.constant 0 : index
    %6 = vector.load %arg3[%c8, %c0_7] : memref<18x8xf32, #tpu.memory_space<vmem>>, vector<8x8xf32>
    %7 = arith.truncf %6 : vector<8x8xf32> to vector<8x8xbf16>
    %c16 = arith.constant 16 : index
    %c0_8 = arith.constant 0 : index
    %8 = vector.load %arg3[%c16, %c0_8] : memref<18x8xf32, #tpu.memory_space<vmem>>, vector<1x8xf32>
    %c17 = arith.constant 17 : index
    %c0_9 = arith.constant 0 : index
    %9 = vector.load %arg3[%c17, %c0_9] : memref<18x8xf32, #tpu.memory_space<vmem>>, vector<1x8xf32>
    %cst = arith.constant dense<0.000000e+00> : vector<32x8xf32>
    %10 = tpu.matmul %3, %5, %cst {dimension_numbers = #tpu.dot_dimension_numbers<[1], [0], [0], [1], [0, 0, 1, 1], [], []>} : vector<32x8xbf16>, vector<8x8xbf16>, vector<32x8xf32> -> vector<32x8xf32>
    %11 = arith.truncf %10 : vector<32x8xf32> to vector<32x8xbf16>
    %cst_10 = arith.constant dense<0.000000e+00> : vector<32x8xf32>
    %12 = tpu.matmul %1, %11, %cst_10 {dimension_numbers = #tpu.dot_dimension_numbers<[1], [0], [0], [1], [0, 0, 1, 1], [], []>} : vector<32x32xbf16>, vector<32x8xbf16>, vector<32x8xf32> -> vector<32x8xf32>
    %13 = vector.broadcast %8 : vector<1x8xf32> to vector<32x8xf32>
    %14 = arith.addf %12, %13 : vector<32x8xf32>
    %cst_11 = arith.constant 0.000000e+00 : f32
    %15 = vector.broadcast %cst_11 : f32 to vector<32x8xf32>
    %16 = arith.maximumf %14, %15 : vector<32x8xf32>
    %17 = arith.truncf %16 : vector<32x8xf32> to vector<32x8xbf16>
    %cst_12 = arith.constant dense<0.000000e+00> : vector<32x8xf32>
    %18 = tpu.matmul %17, %7, %cst_12 {dimension_numbers = #tpu.dot_dimension_numbers<[1], [0], [0], [1], [0, 0, 1, 1], [], []>} : vector<32x8xbf16>, vector<8x8xbf16>, vector<32x8xf32> -> vector<32x8xf32>
    %19 = arith.truncf %18 : vector<32x8xf32> to vector<32x8xbf16>
    %cst_13 = arith.constant dense<0.000000e+00> : vector<32x8xf32>
    %20 = tpu.matmul %1, %19, %cst_13 {dimension_numbers = #tpu.dot_dimension_numbers<[1], [0], [0], [1], [0, 0, 1, 1], [], []>} : vector<32x32xbf16>, vector<32x8xbf16>, vector<32x8xf32> -> vector<32x8xf32>
    %21 = vector.broadcast %9 : vector<1x8xf32> to vector<32x8xf32>
    %22 = arith.addf %20, %21 : vector<32x8xf32>
    %cst_14 = arith.constant 0.000000e+00 : f32
    %23 = vector.broadcast %cst_14 : f32 to vector<32x8xf32>
    %24 = arith.maximumf %22, %23 : vector<32x8xf32>
    %25 = arith.truncf %24 : vector<32x8xf32> to vector<32x8xbf16>
    %cst_15 = arith.constant 0.000000e+00 : f32
    %26 = vector.broadcast %cst_15 : f32 to vector<1x256xf32>
    %27 = vector.extract_strided_slice %25 {offsets = [0, 0], sizes = [1, 8], strides = [1, 1]} : vector<32x8xbf16> to vector<1x8xbf16>
    %c0_16 = arith.constant 0 : index
    %c0_17 = arith.constant 0 : index
    %c0_18 = arith.constant 0 : index
    %28 = vector.load %arg4[%c0_16, %c0_17, %c0_18] : memref<32x8x256xbf16, #tpu.memory_space<vmem>>, vector<1x8x256xbf16>
    %29 = vector.shape_cast %28 : vector<1x8x256xbf16> to vector<8x256xbf16>
    %cst_19 = arith.constant dense<0.000000e+00> : vector<1x256xf32>
    %30 = tpu.matmul %27, %29, %cst_19 {dimension_numbers = #tpu.dot_dimension_numbers<[1], [0], [0], [1], [0, 0, 1, 1], [], []>} : vector<1x8xbf16>, vector<8x256xbf16>, vector<1x256xf32> -> vector<1x256xf32>
    %31 = arith.addf %26, %30 : vector<1x256xf32>
    %32 = vector.extract_strided_slice %25 {offsets = [1, 0], sizes = [1, 8], strides = [1, 1]} : vector<32x8xbf16> to vector<1x8xbf16>
    %c1 = arith.constant 1 : index
    %c0_20 = arith.constant 0 : index
    %c0_21 = arith.constant 0 : index
    %33 = vector.load %arg4[%c1, %c0_20, %c0_21] : memref<32x8x256xbf16, #tpu.memory_space<vmem>>, vector<1x8x256xbf16>
    %34 = vector.shape_cast %33 : vector<1x8x256xbf16> to vector<8x256xbf16>
    %cst_22 = arith.constant dense<0.000000e+00> : vector<1x256xf32>
    %35 = tpu.matmul %32, %34, %cst_22 {dimension_numbers = #tpu.dot_dimension_numbers<[1], [0], [0], [1], [0, 0, 1, 1], [], []>} : vector<1x8xbf16>, vector<8x256xbf16>, vector<1x256xf32> -> vector<1x256xf32>
    %36 = arith.addf %31, %35 : vector<1x256xf32>
    %37 = vector.extract_strided_slice %25 {offsets = [2, 0], sizes = [1, 8], strides = [1, 1]} : vector<32x8xbf16> to vector<1x8xbf16>
    %c2 = arith.constant 2 : index
    %c0_23 = arith.constant 0 : index
    %c0_24 = arith.constant 0 : index
    %38 = vector.load %arg4[%c2, %c0_23, %c0_24] : memref<32x8x256xbf16, #tpu.memory_space<vmem>>, vector<1x8x256xbf16>
    %39 = vector.shape_cast %38 : vector<1x8x256xbf16> to vector<8x256xbf16>
    %cst_25 = arith.constant dense<0.000000e+00> : vector<1x256xf32>
    %40 = tpu.matmul %37, %39, %cst_25 {dimension_numbers = #tpu.dot_dimension_numbers<[1], [0], [0], [1], [0, 0, 1, 1], [], []>} : vector<1x8xbf16>, vector<8x256xbf16>, vector<1x256xf32> -> vector<1x256xf32>
    %41 = arith.addf %36, %40 : vector<1x256xf32>
    %42 = vector.extract_strided_slice %25 {offsets = [3, 0], sizes = [1, 8], strides = [1, 1]} : vector<32x8xbf16> to vector<1x8xbf16>
    %c3 = arith.constant 3 : index
    %c0_26 = arith.constant 0 : index
    %c0_27 = arith.constant 0 : index
    %43 = vector.load %arg4[%c3, %c0_26, %c0_27] : memref<32x8x256xbf16, #tpu.memory_space<vmem>>, vector<1x8x256xbf16>
    %44 = vector.shape_cast %43 : vector<1x8x256xbf16> to vector<8x256xbf16>
    %cst_28 = arith.constant dense<0.000000e+00> : vector<1x256xf32>
    %45 = tpu.matmul %42, %44, %cst_28 {dimension_numbers = #tpu.dot_dimension_numbers<[1], [0], [0], [1], [0, 0, 1, 1], [], []>} : vector<1x8xbf16>, vector<8x256xbf16>, vector<1x256xf32> -> vector<1x256xf32>
    %46 = arith.addf %41, %45 : vector<1x256xf32>
    %47 = vector.extract_strided_slice %25 {offsets = [4, 0], sizes = [1, 8], strides = [1, 1]} : vector<32x8xbf16> to vector<1x8xbf16>
    %c4 = arith.constant 4 : index
    %c0_29 = arith.constant 0 : index
    %c0_30 = arith.constant 0 : index
    %48 = vector.load %arg4[%c4, %c0_29, %c0_30] : memref<32x8x256xbf16, #tpu.memory_space<vmem>>, vector<1x8x256xbf16>
    %49 = vector.shape_cast %48 : vector<1x8x256xbf16> to vector<8x256xbf16>
    %cst_31 = arith.constant dense<0.000000e+00> : vector<1x256xf32>
    %50 = tpu.matmul %47, %49, %cst_31 {dimension_numbers = #tpu.dot_dimension_numbers<[1], [0], [0], [1], [0, 0, 1, 1], [], []>} : vector<1x8xbf16>, vector<8x256xbf16>, vector<1x256xf32> -> vector<1x256xf32>
    %51 = arith.addf %46, %50 : vector<1x256xf32>
    %52 = vector.extract_strided_slice %25 {offsets = [5, 0], sizes = [1, 8], strides = [1, 1]} : vector<32x8xbf16> to vector<1x8xbf16>
    %c5 = arith.constant 5 : index
    %c0_32 = arith.constant 0 : index
    %c0_33 = arith.constant 0 : index
    %53 = vector.load %arg4[%c5, %c0_32, %c0_33] : memref<32x8x256xbf16, #tpu.memory_space<vmem>>, vector<1x8x256xbf16>
    %54 = vector.shape_cast %53 : vector<1x8x256xbf16> to vector<8x256xbf16>
    %cst_34 = arith.constant dense<0.000000e+00> : vector<1x256xf32>
    %55 = tpu.matmul %52, %54, %cst_34 {dimension_numbers = #tpu.dot_dimension_numbers<[1], [0], [0], [1], [0, 0, 1, 1], [], []>} : vector<1x8xbf16>, vector<8x256xbf16>, vector<1x256xf32> -> vector<1x256xf32>
    %56 = arith.addf %51, %55 : vector<1x256xf32>
    %57 = vector.extract_strided_slice %25 {offsets = [6, 0], sizes = [1, 8], strides = [1, 1]} : vector<32x8xbf16> to vector<1x8xbf16>
    %c6 = arith.constant 6 : index
    %c0_35 = arith.constant 0 : index
    %c0_36 = arith.constant 0 : index
    %58 = vector.load %arg4[%c6, %c0_35, %c0_36] : memref<32x8x256xbf16, #tpu.memory_space<vmem>>, vector<1x8x256xbf16>
    %59 = vector.shape_cast %58 : vector<1x8x256xbf16> to vector<8x256xbf16>
    %cst_37 = arith.constant dense<0.000000e+00> : vector<1x256xf32>
    %60 = tpu.matmul %57, %59, %cst_37 {dimension_numbers = #tpu.dot_dimension_numbers<[1], [0], [0], [1], [0, 0, 1, 1], [], []>} : vector<1x8xbf16>, vector<8x256xbf16>, vector<1x256xf32> -> vector<1x256xf32>
    %61 = arith.addf %56, %60 : vector<1x256xf32>
    %62 = vector.extract_strided_slice %25 {offsets = [7, 0], sizes = [1, 8], strides = [1, 1]} : vector<32x8xbf16> to vector<1x8xbf16>
    %c7 = arith.constant 7 : index
    %c0_38 = arith.constant 0 : index
    %c0_39 = arith.constant 0 : index
    %63 = vector.load %arg4[%c7, %c0_38, %c0_39] : memref<32x8x256xbf16, #tpu.memory_space<vmem>>, vector<1x8x256xbf16>
    %64 = vector.shape_cast %63 : vector<1x8x256xbf16> to vector<8x256xbf16>
    %cst_40 = arith.constant dense<0.000000e+00> : vector<1x256xf32>
    %65 = tpu.matmul %62, %64, %cst_40 {dimension_numbers = #tpu.dot_dimension_numbers<[1], [0], [0], [1], [0, 0, 1, 1], [], []>} : vector<1x8xbf16>, vector<8x256xbf16>, vector<1x256xf32> -> vector<1x256xf32>
    %66 = arith.addf %61, %65 : vector<1x256xf32>
    %67 = vector.extract_strided_slice %25 {offsets = [8, 0], sizes = [1, 8], strides = [1, 1]} : vector<32x8xbf16> to vector<1x8xbf16>
    %c8_41 = arith.constant 8 : index
    %c0_42 = arith.constant 0 : index
    %c0_43 = arith.constant 0 : index
    %68 = vector.load %arg4[%c8_41, %c0_42, %c0_43] : memref<32x8x256xbf16, #tpu.memory_space<vmem>>, vector<1x8x256xbf16>
    %69 = vector.shape_cast %68 : vector<1x8x256xbf16> to vector<8x256xbf16>
    %cst_44 = arith.constant dense<0.000000e+00> : vector<1x256xf32>
    %70 = tpu.matmul %67, %69, %cst_44 {dimension_numbers = #tpu.dot_dimension_numbers<[1], [0], [0], [1], [0, 0, 1, 1], [], []>} : vector<1x8xbf16>, vector<8x256xbf16>, vector<1x256xf32> -> vector<1x256xf32>
    %71 = arith.addf %66, %70 : vector<1x256xf32>
    %72 = vector.extract_strided_slice %25 {offsets = [9, 0], sizes = [1, 8], strides = [1, 1]} : vector<32x8xbf16> to vector<1x8xbf16>
    %c9 = arith.constant 9 : index
    %c0_45 = arith.constant 0 : index
    %c0_46 = arith.constant 0 : index
    %73 = vector.load %arg4[%c9, %c0_45, %c0_46] : memref<32x8x256xbf16, #tpu.memory_space<vmem>>, vector<1x8x256xbf16>
    %74 = vector.shape_cast %73 : vector<1x8x256xbf16> to vector<8x256xbf16>
    %cst_47 = arith.constant dense<0.000000e+00> : vector<1x256xf32>
    %75 = tpu.matmul %72, %74, %cst_47 {dimension_numbers = #tpu.dot_dimension_numbers<[1], [0], [0], [1], [0, 0, 1, 1], [], []>} : vector<1x8xbf16>, vector<8x256xbf16>, vector<1x256xf32> -> vector<1x256xf32>
    %76 = arith.addf %71, %75 : vector<1x256xf32>
    %77 = vector.extract_strided_slice %25 {offsets = [10, 0], sizes = [1, 8], strides = [1, 1]} : vector<32x8xbf16> to vector<1x8xbf16>
    %c10 = arith.constant 10 : index
    %c0_48 = arith.constant 0 : index
    %c0_49 = arith.constant 0 : index
    %78 = vector.load %arg4[%c10, %c0_48, %c0_49] : memref<32x8x256xbf16, #tpu.memory_space<vmem>>, vector<1x8x256xbf16>
    %79 = vector.shape_cast %78 : vector<1x8x256xbf16> to vector<8x256xbf16>
    %cst_50 = arith.constant dense<0.000000e+00> : vector<1x256xf32>
    %80 = tpu.matmul %77, %79, %cst_50 {dimension_numbers = #tpu.dot_dimension_numbers<[1], [0], [0], [1], [0, 0, 1, 1], [], []>} : vector<1x8xbf16>, vector<8x256xbf16>, vector<1x256xf32> -> vector<1x256xf32>
    %81 = arith.addf %76, %80 : vector<1x256xf32>
    %82 = vector.extract_strided_slice %25 {offsets = [11, 0], sizes = [1, 8], strides = [1, 1]} : vector<32x8xbf16> to vector<1x8xbf16>
    %c11 = arith.constant 11 : index
    %c0_51 = arith.constant 0 : index
    %c0_52 = arith.constant 0 : index
    %83 = vector.load %arg4[%c11, %c0_51, %c0_52] : memref<32x8x256xbf16, #tpu.memory_space<vmem>>, vector<1x8x256xbf16>
    %84 = vector.shape_cast %83 : vector<1x8x256xbf16> to vector<8x256xbf16>
    %cst_53 = arith.constant dense<0.000000e+00> : vector<1x256xf32>
    %85 = tpu.matmul %82, %84, %cst_53 {dimension_numbers = #tpu.dot_dimension_numbers<[1], [0], [0], [1], [0, 0, 1, 1], [], []>} : vector<1x8xbf16>, vector<8x256xbf16>, vector<1x256xf32> -> vector<1x256xf32>
    %86 = arith.addf %81, %85 : vector<1x256xf32>
    %87 = vector.extract_strided_slice %25 {offsets = [12, 0], sizes = [1, 8], strides = [1, 1]} : vector<32x8xbf16> to vector<1x8xbf16>
    %c12 = arith.constant 12 : index
    %c0_54 = arith.constant 0 : index
    %c0_55 = arith.constant 0 : index
    %88 = vector.load %arg4[%c12, %c0_54, %c0_55] : memref<32x8x256xbf16, #tpu.memory_space<vmem>>, vector<1x8x256xbf16>
    %89 = vector.shape_cast %88 : vector<1x8x256xbf16> to vector<8x256xbf16>
    %cst_56 = arith.constant dense<0.000000e+00> : vector<1x256xf32>
    %90 = tpu.matmul %87, %89, %cst_56 {dimension_numbers = #tpu.dot_dimension_numbers<[1], [0], [0], [1], [0, 0, 1, 1], [], []>} : vector<1x8xbf16>, vector<8x256xbf16>, vector<1x256xf32> -> vector<1x256xf32>
    %91 = arith.addf %86, %90 : vector<1x256xf32>
    %92 = vector.extract_strided_slice %25 {offsets = [13, 0], sizes = [1, 8], strides = [1, 1]} : vector<32x8xbf16> to vector<1x8xbf16>
    %c13 = arith.constant 13 : index
    %c0_57 = arith.constant 0 : index
    %c0_58 = arith.constant 0 : index
    %93 = vector.load %arg4[%c13, %c0_57, %c0_58] : memref<32x8x256xbf16, #tpu.memory_space<vmem>>, vector<1x8x256xbf16>
    %94 = vector.shape_cast %93 : vector<1x8x256xbf16> to vector<8x256xbf16>
    %cst_59 = arith.constant dense<0.000000e+00> : vector<1x256xf32>
    %95 = tpu.matmul %92, %94, %cst_59 {dimension_numbers = #tpu.dot_dimension_numbers<[1], [0], [0], [1], [0, 0, 1, 1], [], []>} : vector<1x8xbf16>, vector<8x256xbf16>, vector<1x256xf32> -> vector<1x256xf32>
    %96 = arith.addf %91, %95 : vector<1x256xf32>
    %97 = vector.extract_strided_slice %25 {offsets = [14, 0], sizes = [1, 8], strides = [1, 1]} : vector<32x8xbf16> to vector<1x8xbf16>
    %c14 = arith.constant 14 : index
    %c0_60 = arith.constant 0 : index
    %c0_61 = arith.constant 0 : index
    %98 = vector.load %arg4[%c14, %c0_60, %c0_61] : memref<32x8x256xbf16, #tpu.memory_space<vmem>>, vector<1x8x256xbf16>
    %99 = vector.shape_cast %98 : vector<1x8x256xbf16> to vector<8x256xbf16>
    %cst_62 = arith.constant dense<0.000000e+00> : vector<1x256xf32>
    %100 = tpu.matmul %97, %99, %cst_62 {dimension_numbers = #tpu.dot_dimension_numbers<[1], [0], [0], [1], [0, 0, 1, 1], [], []>} : vector<1x8xbf16>, vector<8x256xbf16>, vector<1x256xf32> -> vector<1x256xf32>
    %101 = arith.addf %96, %100 : vector<1x256xf32>
    %102 = vector.extract_strided_slice %25 {offsets = [15, 0], sizes = [1, 8], strides = [1, 1]} : vector<32x8xbf16> to vector<1x8xbf16>
    %c15 = arith.constant 15 : index
    %c0_63 = arith.constant 0 : index
    %c0_64 = arith.constant 0 : index
    %103 = vector.load %arg4[%c15, %c0_63, %c0_64] : memref<32x8x256xbf16, #tpu.memory_space<vmem>>, vector<1x8x256xbf16>
    %104 = vector.shape_cast %103 : vector<1x8x256xbf16> to vector<8x256xbf16>
    %cst_65 = arith.constant dense<0.000000e+00> : vector<1x256xf32>
    %105 = tpu.matmul %102, %104, %cst_65 {dimension_numbers = #tpu.dot_dimension_numbers<[1], [0], [0], [1], [0, 0, 1, 1], [], []>} : vector<1x8xbf16>, vector<8x256xbf16>, vector<1x256xf32> -> vector<1x256xf32>
    %106 = arith.addf %101, %105 : vector<1x256xf32>
    %107 = vector.extract_strided_slice %25 {offsets = [16, 0], sizes = [1, 8], strides = [1, 1]} : vector<32x8xbf16> to vector<1x8xbf16>
    %c16_66 = arith.constant 16 : index
    %c0_67 = arith.constant 0 : index
    %c0_68 = arith.constant 0 : index
    %108 = vector.load %arg4[%c16_66, %c0_67, %c0_68] : memref<32x8x256xbf16, #tpu.memory_space<vmem>>, vector<1x8x256xbf16>
    %109 = vector.shape_cast %108 : vector<1x8x256xbf16> to vector<8x256xbf16>
    %cst_69 = arith.constant dense<0.000000e+00> : vector<1x256xf32>
    %110 = tpu.matmul %107, %109, %cst_69 {dimension_numbers = #tpu.dot_dimension_numbers<[1], [0], [0], [1], [0, 0, 1, 1], [], []>} : vector<1x8xbf16>, vector<8x256xbf16>, vector<1x256xf32> -> vector<1x256xf32>
    %111 = arith.addf %106, %110 : vector<1x256xf32>
    %112 = vector.extract_strided_slice %25 {offsets = [17, 0], sizes = [1, 8], strides = [1, 1]} : vector<32x8xbf16> to vector<1x8xbf16>
    %c17_70 = arith.constant 17 : index
    %c0_71 = arith.constant 0 : index
    %c0_72 = arith.constant 0 : index
    %113 = vector.load %arg4[%c17_70, %c0_71, %c0_72] : memref<32x8x256xbf16, #tpu.memory_space<vmem>>, vector<1x8x256xbf16>
    %114 = vector.shape_cast %113 : vector<1x8x256xbf16> to vector<8x256xbf16>
    %cst_73 = arith.constant dense<0.000000e+00> : vector<1x256xf32>
    %115 = tpu.matmul %112, %114, %cst_73 {dimension_numbers = #tpu.dot_dimension_numbers<[1], [0], [0], [1], [0, 0, 1, 1], [], []>} : vector<1x8xbf16>, vector<8x256xbf16>, vector<1x256xf32> -> vector<1x256xf32>
    %116 = arith.addf %111, %115 : vector<1x256xf32>
    %117 = vector.extract_strided_slice %25 {offsets = [18, 0], sizes = [1, 8], strides = [1, 1]} : vector<32x8xbf16> to vector<1x8xbf16>
    %c18 = arith.constant 18 : index
    %c0_74 = arith.constant 0 : index
    %c0_75 = arith.constant 0 : index
    %118 = vector.load %arg4[%c18, %c0_74, %c0_75] : memref<32x8x256xbf16, #tpu.memory_space<vmem>>, vector<1x8x256xbf16>
    %119 = vector.shape_cast %118 : vector<1x8x256xbf16> to vector<8x256xbf16>
    %cst_76 = arith.constant dense<0.000000e+00> : vector<1x256xf32>
    %120 = tpu.matmul %117, %119, %cst_76 {dimension_numbers = #tpu.dot_dimension_numbers<[1], [0], [0], [1], [0, 0, 1, 1], [], []>} : vector<1x8xbf16>, vector<8x256xbf16>, vector<1x256xf32> -> vector<1x256xf32>
    %121 = arith.addf %116, %120 : vector<1x256xf32>
    %122 = vector.extract_strided_slice %25 {offsets = [19, 0], sizes = [1, 8], strides = [1, 1]} : vector<32x8xbf16> to vector<1x8xbf16>
    %c19 = arith.constant 19 : index
    %c0_77 = arith.constant 0 : index
    %c0_78 = arith.constant 0 : index
    %123 = vector.load %arg4[%c19, %c0_77, %c0_78] : memref<32x8x256xbf16, #tpu.memory_space<vmem>>, vector<1x8x256xbf16>
    %124 = vector.shape_cast %123 : vector<1x8x256xbf16> to vector<8x256xbf16>
    %cst_79 = arith.constant dense<0.000000e+00> : vector<1x256xf32>
    %125 = tpu.matmul %122, %124, %cst_79 {dimension_numbers = #tpu.dot_dimension_numbers<[1], [0], [0], [1], [0, 0, 1, 1], [], []>} : vector<1x8xbf16>, vector<8x256xbf16>, vector<1x256xf32> -> vector<1x256xf32>
    %126 = arith.addf %121, %125 : vector<1x256xf32>
    %127 = vector.extract_strided_slice %25 {offsets = [20, 0], sizes = [1, 8], strides = [1, 1]} : vector<32x8xbf16> to vector<1x8xbf16>
    %c20 = arith.constant 20 : index
    %c0_80 = arith.constant 0 : index
    %c0_81 = arith.constant 0 : index
    %128 = vector.load %arg4[%c20, %c0_80, %c0_81] : memref<32x8x256xbf16, #tpu.memory_space<vmem>>, vector<1x8x256xbf16>
    %129 = vector.shape_cast %128 : vector<1x8x256xbf16> to vector<8x256xbf16>
    %cst_82 = arith.constant dense<0.000000e+00> : vector<1x256xf32>
    %130 = tpu.matmul %127, %129, %cst_82 {dimension_numbers = #tpu.dot_dimension_numbers<[1], [0], [0], [1], [0, 0, 1, 1], [], []>} : vector<1x8xbf16>, vector<8x256xbf16>, vector<1x256xf32> -> vector<1x256xf32>
    %131 = arith.addf %126, %130 : vector<1x256xf32>
    %132 = vector.extract_strided_slice %25 {offsets = [21, 0], sizes = [1, 8], strides = [1, 1]} : vector<32x8xbf16> to vector<1x8xbf16>
    %c21 = arith.constant 21 : index
    %c0_83 = arith.constant 0 : index
    %c0_84 = arith.constant 0 : index
    %133 = vector.load %arg4[%c21, %c0_83, %c0_84] : memref<32x8x256xbf16, #tpu.memory_space<vmem>>, vector<1x8x256xbf16>
    %134 = vector.shape_cast %133 : vector<1x8x256xbf16> to vector<8x256xbf16>
    %cst_85 = arith.constant dense<0.000000e+00> : vector<1x256xf32>
    %135 = tpu.matmul %132, %134, %cst_85 {dimension_numbers = #tpu.dot_dimension_numbers<[1], [0], [0], [1], [0, 0, 1, 1], [], []>} : vector<1x8xbf16>, vector<8x256xbf16>, vector<1x256xf32> -> vector<1x256xf32>
    %136 = arith.addf %131, %135 : vector<1x256xf32>
    %137 = vector.extract_strided_slice %25 {offsets = [22, 0], sizes = [1, 8], strides = [1, 1]} : vector<32x8xbf16> to vector<1x8xbf16>
    %c22 = arith.constant 22 : index
    %c0_86 = arith.constant 0 : index
    %c0_87 = arith.constant 0 : index
    %138 = vector.load %arg4[%c22, %c0_86, %c0_87] : memref<32x8x256xbf16, #tpu.memory_space<vmem>>, vector<1x8x256xbf16>
    %139 = vector.shape_cast %138 : vector<1x8x256xbf16> to vector<8x256xbf16>
    %cst_88 = arith.constant dense<0.000000e+00> : vector<1x256xf32>
    %140 = tpu.matmul %137, %139, %cst_88 {dimension_numbers = #tpu.dot_dimension_numbers<[1], [0], [0], [1], [0, 0, 1, 1], [], []>} : vector<1x8xbf16>, vector<8x256xbf16>, vector<1x256xf32> -> vector<1x256xf32>
    %141 = arith.addf %136, %140 : vector<1x256xf32>
    %142 = vector.extract_strided_slice %25 {offsets = [23, 0], sizes = [1, 8], strides = [1, 1]} : vector<32x8xbf16> to vector<1x8xbf16>
    %c23 = arith.constant 23 : index
    %c0_89 = arith.constant 0 : index
    %c0_90 = arith.constant 0 : index
    %143 = vector.load %arg4[%c23, %c0_89, %c0_90] : memref<32x8x256xbf16, #tpu.memory_space<vmem>>, vector<1x8x256xbf16>
    %144 = vector.shape_cast %143 : vector<1x8x256xbf16> to vector<8x256xbf16>
    %cst_91 = arith.constant dense<0.000000e+00> : vector<1x256xf32>
    %145 = tpu.matmul %142, %144, %cst_91 {dimension_numbers = #tpu.dot_dimension_numbers<[1], [0], [0], [1], [0, 0, 1, 1], [], []>} : vector<1x8xbf16>, vector<8x256xbf16>, vector<1x256xf32> -> vector<1x256xf32>
    %146 = arith.addf %141, %145 : vector<1x256xf32>
    %147 = vector.extract_strided_slice %25 {offsets = [24, 0], sizes = [1, 8], strides = [1, 1]} : vector<32x8xbf16> to vector<1x8xbf16>
    %c24 = arith.constant 24 : index
    %c0_92 = arith.constant 0 : index
    %c0_93 = arith.constant 0 : index
    %148 = vector.load %arg4[%c24, %c0_92, %c0_93] : memref<32x8x256xbf16, #tpu.memory_space<vmem>>, vector<1x8x256xbf16>
    %149 = vector.shape_cast %148 : vector<1x8x256xbf16> to vector<8x256xbf16>
    %cst_94 = arith.constant dense<0.000000e+00> : vector<1x256xf32>
    %150 = tpu.matmul %147, %149, %cst_94 {dimension_numbers = #tpu.dot_dimension_numbers<[1], [0], [0], [1], [0, 0, 1, 1], [], []>} : vector<1x8xbf16>, vector<8x256xbf16>, vector<1x256xf32> -> vector<1x256xf32>
    %151 = arith.addf %146, %150 : vector<1x256xf32>
    %152 = vector.extract_strided_slice %25 {offsets = [25, 0], sizes = [1, 8], strides = [1, 1]} : vector<32x8xbf16> to vector<1x8xbf16>
    %c25 = arith.constant 25 : index
    %c0_95 = arith.constant 0 : index
    %c0_96 = arith.constant 0 : index
    %153 = vector.load %arg4[%c25, %c0_95, %c0_96] : memref<32x8x256xbf16, #tpu.memory_space<vmem>>, vector<1x8x256xbf16>
    %154 = vector.shape_cast %153 : vector<1x8x256xbf16> to vector<8x256xbf16>
    %cst_97 = arith.constant dense<0.000000e+00> : vector<1x256xf32>
    %155 = tpu.matmul %152, %154, %cst_97 {dimension_numbers = #tpu.dot_dimension_numbers<[1], [0], [0], [1], [0, 0, 1, 1], [], []>} : vector<1x8xbf16>, vector<8x256xbf16>, vector<1x256xf32> -> vector<1x256xf32>
    %156 = arith.addf %151, %155 : vector<1x256xf32>
    %157 = vector.extract_strided_slice %25 {offsets = [26, 0], sizes = [1, 8], strides = [1, 1]} : vector<32x8xbf16> to vector<1x8xbf16>
    %c26 = arith.constant 26 : index
    %c0_98 = arith.constant 0 : index
    %c0_99 = arith.constant 0 : index
    %158 = vector.load %arg4[%c26, %c0_98, %c0_99] : memref<32x8x256xbf16, #tpu.memory_space<vmem>>, vector<1x8x256xbf16>
    %159 = vector.shape_cast %158 : vector<1x8x256xbf16> to vector<8x256xbf16>
    %cst_100 = arith.constant dense<0.000000e+00> : vector<1x256xf32>
    %160 = tpu.matmul %157, %159, %cst_100 {dimension_numbers = #tpu.dot_dimension_numbers<[1], [0], [0], [1], [0, 0, 1, 1], [], []>} : vector<1x8xbf16>, vector<8x256xbf16>, vector<1x256xf32> -> vector<1x256xf32>
    %161 = arith.addf %156, %160 : vector<1x256xf32>
    %162 = vector.extract_strided_slice %25 {offsets = [27, 0], sizes = [1, 8], strides = [1, 1]} : vector<32x8xbf16> to vector<1x8xbf16>
    %c27 = arith.constant 27 : index
    %c0_101 = arith.constant 0 : index
    %c0_102 = arith.constant 0 : index
    %163 = vector.load %arg4[%c27, %c0_101, %c0_102] : memref<32x8x256xbf16, #tpu.memory_space<vmem>>, vector<1x8x256xbf16>
    %164 = vector.shape_cast %163 : vector<1x8x256xbf16> to vector<8x256xbf16>
    %cst_103 = arith.constant dense<0.000000e+00> : vector<1x256xf32>
    %165 = tpu.matmul %162, %164, %cst_103 {dimension_numbers = #tpu.dot_dimension_numbers<[1], [0], [0], [1], [0, 0, 1, 1], [], []>} : vector<1x8xbf16>, vector<8x256xbf16>, vector<1x256xf32> -> vector<1x256xf32>
    %166 = arith.addf %161, %165 : vector<1x256xf32>
    %167 = vector.extract_strided_slice %25 {offsets = [28, 0], sizes = [1, 8], strides = [1, 1]} : vector<32x8xbf16> to vector<1x8xbf16>
    %c28 = arith.constant 28 : index
    %c0_104 = arith.constant 0 : index
    %c0_105 = arith.constant 0 : index
    %168 = vector.load %arg4[%c28, %c0_104, %c0_105] : memref<32x8x256xbf16, #tpu.memory_space<vmem>>, vector<1x8x256xbf16>
    %169 = vector.shape_cast %168 : vector<1x8x256xbf16> to vector<8x256xbf16>
    %cst_106 = arith.constant dense<0.000000e+00> : vector<1x256xf32>
    %170 = tpu.matmul %167, %169, %cst_106 {dimension_numbers = #tpu.dot_dimension_numbers<[1], [0], [0], [1], [0, 0, 1, 1], [], []>} : vector<1x8xbf16>, vector<8x256xbf16>, vector<1x256xf32> -> vector<1x256xf32>
    %171 = arith.addf %166, %170 : vector<1x256xf32>
    %172 = vector.extract_strided_slice %25 {offsets = [29, 0], sizes = [1, 8], strides = [1, 1]} : vector<32x8xbf16> to vector<1x8xbf16>
    %c29 = arith.constant 29 : index
    %c0_107 = arith.constant 0 : index
    %c0_108 = arith.constant 0 : index
    %173 = vector.load %arg4[%c29, %c0_107, %c0_108] : memref<32x8x256xbf16, #tpu.memory_space<vmem>>, vector<1x8x256xbf16>
    %174 = vector.shape_cast %173 : vector<1x8x256xbf16> to vector<8x256xbf16>
    %cst_109 = arith.constant dense<0.000000e+00> : vector<1x256xf32>
    %175 = tpu.matmul %172, %174, %cst_109 {dimension_numbers = #tpu.dot_dimension_numbers<[1], [0], [0], [1], [0, 0, 1, 1], [], []>} : vector<1x8xbf16>, vector<8x256xbf16>, vector<1x256xf32> -> vector<1x256xf32>
    %176 = arith.addf %171, %175 : vector<1x256xf32>
    %177 = vector.extract_strided_slice %25 {offsets = [30, 0], sizes = [1, 8], strides = [1, 1]} : vector<32x8xbf16> to vector<1x8xbf16>
    %c30 = arith.constant 30 : index
    %c0_110 = arith.constant 0 : index
    %c0_111 = arith.constant 0 : index
    %178 = vector.load %arg4[%c30, %c0_110, %c0_111] : memref<32x8x256xbf16, #tpu.memory_space<vmem>>, vector<1x8x256xbf16>
    %179 = vector.shape_cast %178 : vector<1x8x256xbf16> to vector<8x256xbf16>
    %cst_112 = arith.constant dense<0.000000e+00> : vector<1x256xf32>
    %180 = tpu.matmul %177, %179, %cst_112 {dimension_numbers = #tpu.dot_dimension_numbers<[1], [0], [0], [1], [0, 0, 1, 1], [], []>} : vector<1x8xbf16>, vector<8x256xbf16>, vector<1x256xf32> -> vector<1x256xf32>
    %181 = arith.addf %176, %180 : vector<1x256xf32>
    %182 = vector.extract_strided_slice %25 {offsets = [31, 0], sizes = [1, 8], strides = [1, 1]} : vector<32x8xbf16> to vector<1x8xbf16>
    %c31 = arith.constant 31 : index
    %c0_113 = arith.constant 0 : index
    %c0_114 = arith.constant 0 : index
    %183 = vector.load %arg4[%c31, %c0_113, %c0_114] : memref<32x8x256xbf16, #tpu.memory_space<vmem>>, vector<1x8x256xbf16>
    %184 = vector.shape_cast %183 : vector<1x8x256xbf16> to vector<8x256xbf16>
    %cst_115 = arith.constant dense<0.000000e+00> : vector<1x256xf32>
    %185 = tpu.matmul %182, %184, %cst_115 {dimension_numbers = #tpu.dot_dimension_numbers<[1], [0], [0], [1], [0, 0, 1, 1], [], []>} : vector<1x8xbf16>, vector<8x256xbf16>, vector<1x256xf32> -> vector<1x256xf32>
    %186 = arith.addf %181, %185 : vector<1x256xf32>
    %c0_116 = arith.constant 0 : index
    %c0_117 = arith.constant 0 : index
    %187 = vector.load %arg5[%c0_116, %c0_117] : memref<2x256xf32, #tpu.memory_space<vmem>>, vector<1x256xf32>
    %188 = arith.addf %186, %187 : vector<1x256xf32>
    %cst_118 = arith.constant 0.000000e+00 : f32
    %189 = vector.broadcast %cst_118 : f32 to vector<1x256xf32>
    %190 = arith.maximumf %188, %189 : vector<1x256xf32>
    %191 = arith.truncf %190 : vector<1x256xf32> to vector<1x256xbf16>
    %c0_119 = arith.constant 0 : index
    %c0_120 = arith.constant 0 : index
    %192 = vector.load %arg6[%c0_119, %c0_120] : memref<256x128xbf16, #tpu.memory_space<vmem>>, vector<256x128xbf16>
    %cst_121 = arith.constant dense<0.000000e+00> : vector<1x128xf32>
    %193 = tpu.matmul %191, %192, %cst_121 {dimension_numbers = #tpu.dot_dimension_numbers<[1], [0], [0], [1], [0, 0, 1, 1], [], []>} : vector<1x256xbf16>, vector<256x128xbf16>, vector<1x128xf32> -> vector<1x128xf32>
    %c1_122 = arith.constant 1 : index
    %c0_123 = arith.constant 0 : index
    %194 = vector.load %arg5[%c1_122, %c0_123] : memref<2x256xf32, #tpu.memory_space<vmem>>, vector<1x128xf32>
    %195 = arith.addf %193, %194 : vector<1x128xf32>
    %196 = arith.negf %195 : vector<1x128xf32>
    %197 = math.exp %196 : vector<1x128xf32>
    %cst_124 = arith.constant 1.000000e+00 : f32
    %198 = vector.broadcast %cst_124 : f32 to vector<1x128xf32>
    %199 = arith.addf %198, %197 : vector<1x128xf32>
    %200 = arith.divf %198, %199 : vector<1x128xf32>
    %c0_125 = arith.constant 0 : index
    %c0_126 = arith.constant 0 : index
    %201 = vector.load %arg7[%c0_125, %c0_126] : memref<1x128xf32, #tpu.memory_space<vmem>>, vector<1x128xf32>
    tpu.vector_store %arg7[%c0_125, %c0_126], %200 {strides = array<i32>} : memref<1x128xf32, #tpu.memory_space<vmem>>, vector<1x128xf32>,
    return
  }
  func.func @transform_0(%arg0: i32) -> (i32, i32, i32) {
    %c0_i32 = arith.constant 0 : i32
    %c0_i32_0 = arith.constant 0 : i32
    %c0_i32_1 = arith.constant 0 : i32
    return %arg0, %c0_i32, %c0_i32_0 : i32, i32, i32
  }
  func.func @transform_1(%arg0: i32) -> (i32, i32, i32) {
    %c0_i32 = arith.constant 0 : i32
    %c0_i32_0 = arith.constant 0 : i32
    %c0_i32_1 = arith.constant 0 : i32
    return %arg0, %c0_i32, %c0_i32_0 : i32, i32, i32
  }
  func.func @transform_2(%arg0: i32) -> (i32, i32) {
    %c0_i32 = arith.constant 0 : i32
    %c0_i32_0 = arith.constant 0 : i32
    %c0_i32_1 = arith.constant 0 : i32
    return %c0_i32, %c0_i32_0 : i32, i32
  }
  func.func @transform_3(%arg0: i32) -> (i32, i32, i32) {
    %c0_i32 = arith.constant 0 : i32
    %c0_i32_0 = arith.constant 0 : i32
    %c0_i32_1 = arith.constant 0 : i32
    %c0_i32_2 = arith.constant 0 : i32
    return %c0_i32, %c0_i32_0, %c0_i32_1 : i32, i32, i32
  }
  func.func @transform_4(%arg0: i32) -> (i32, i32) {
    %c0_i32 = arith.constant 0 : i32
    %c0_i32_0 = arith.constant 0 : i32
    %c0_i32_1 = arith.constant 0 : i32
    return %c0_i32, %c0_i32_0 : i32, i32
  }
  func.func @transform_5(%arg0: i32) -> (i32, i32) {
    %c0_i32 = arith.constant 0 : i32
    %c0_i32_0 = arith.constant 0 : i32
    %c0_i32_1 = arith.constant 0 : i32
    return %c0_i32, %c0_i32_0 : i32, i32
  }
  func.func @transform_6(%arg0: i32) -> (i32, i32) {
    %c0_i32 = arith.constant 0 : i32
    %c0_i32_0 = arith.constant 0 : i32
    return %arg0, %c0_i32 : i32, i32
  }
}

</mosaic_0001>

<bundles_post_ra>
// kernel: _fused_forward.1
= control target key start
LH: loop header
LB: loop body
LE: loop exit
PB: predicated region body
PF: predicated region fallthrough
CT: control target
= control target key end

     0   :  { %vm56_vm0 = vcmask 1043456   ;;  %vm49_vm1 = vcmask 64512   ;;  %s3195_s0 = inlined_call_operand.vmem [shape: bf16[1,32,32], index: 0, kind: input, shape index: {}]   ;;  %s3196_s1 = inlined_call_operand.vmem [shape: bf16[1,32,8], index: 1, kind: input, shape index: {}]   ;;  %s3197_s2 = inlined_call_operand.vmem [shape: f32[18,8], index: 2, kind: input, shape index: {}]   ;;  %s3198_s3 = inlined_call_operand.vmem [shape: bf16[32,8,256], index: 3, kind: input, shape index: {}]   ;;  %s3199_s4 = inlined_call_operand.vmem [shape: f32[2,256], index: 4, kind: input, shape index: {}]   ;;  %s3200_s5 = inlined_call_operand.vmem [shape: bf16[256,128], index: 5, kind: input, shape index: {}]   ;;  %s3201_s6 = inlined_call_operand.hbm [shape: f32[1,128], index: 6, kind: output, shape index: {}]  }
   0x1   :  { %v33_v0 = vld [vmem:[%s3197_s2] sm:$0xff]  ;;  %v2690_v4 = vld [vmem:[%s3196_s1 + $0x8] sm:$0xff]  }
   0x2   :  { %v34_v1 = vpack.c.bf16 %v33_v0, %v33_v0  ;;  %v2689_v2 = vld [vmem:[%s3196_s1] sm:$0xff]  }
   0x3   :  { %2659 = vmatprep.mubr.msk.bf16.mxu1 %vm49_vm1, %v2689_v2 }
   0x4   :  { %2685 = vmatprep.subr.msk.bf16.mxu1 %vm56_vm0, %v34_v1  ;;  %v58_v3 = vsel %vm56_vm0, %v34_v1, 0 }
   0x5   :  { %2658 = vmatpush3.bf16.msra.mxu1 %v58_v3 }
   0x8   :  { %2660 = vmatmul.mubr.msk.bf16.vlgmr.msra.gmra.mxu1 %vm49_vm1, %v2690_v4 }
   0x9   :  { %11 = vsyncpa [#allocation3], 0  ;;  %v2691_v5 = vld [vmem:[%s3195_s0] sm:$0xff]   ;;  %vm125_vm2 = vcmask 261120   ;;  %v2692_v12 = vld [vmem:[%s3195_s0 + $0x8] sm:$0xff]   ;;  %v2799_v45 = vmov 0  }
   0xa   :  { %2667 = vmatprep.mubr.msk.bf16.mxu1 %vm125_vm2, %v2691_v5  ;;  %v35_v13 = vld [vmem:[%s3197_s2 + $0x8] sm:$0xff]  ;;  %v2435_v18 = vld [vmem:[%s3197_s2 + $0x10] ss:$0 sm:$0xff]  ;;  %v306_v37 = vld [vmem:[%s3198_s3] sm:$0xff]  ;;  %358 = vmatprep.mubr.bf16.mxu0 %v2799_v45  ;;  %s2800_s26 = smov [#allocation2]  }
   0xb   :  { %v36_v14 = vpack.c.bf16 %v35_v13, %v35_v13  ;;  %v2451_v38 = vcombine.high %v306_v37, %v306_v37  ;;  %v2450_v39 = vcombine.low %v306_v37, %v306_v37  ;;  %v2445_v40 = vld [vmem:[%s3198_s3 + $0x8] sm:$0xff]  ;;  %v2459_v46 = vld [vmem:[%s3198_s3 + $0x18] sm:$0xff]  ;;  %v2454_v47 = vld [vmem:[%s3198_s3 + $0x10] sm:$0xff]  ;;  %s2423_s27 = sshll.u32 %s2800_s26, 4  ;;  %s2424_s27 = int_to_ptr.vmem [resolvable:$true] %s2423_s27 }
   0xc   :  { %v2447_v42 = vcombine.high %v2445_v40, %v2445_v40  ;;  %v2446_v43 = vcombine.low %v2445_v40, %v2445_v40  ;;  %v2461_v48 = vcombine.high %v2459_v46, %v2459_v46  ;;  %v2456_v49 = vcombine.high %v2454_v47, %v2454_v47  ;;  %v2442_v51 = vld [vmem:[%s3197_s2 + $0x11] ss:$0 sm:$0xff]  ;;  %v2469_v62 = vld [vmem:[%s3198_s3 + $0x28] sm:$0xff]  ;;  %v2464_v3 = vld [vmem:[%s3198_s3 + $0x20] sm:$0xff]  ;;  %s2777_s28 = scalar_lea.vmem %s2424_s27, 16  ;;  %s2781_s1 = scalar_lea.vmem %s2424_s27, 32 }
   0xd   :  { %v194_v15 = vsel %vm56_vm0, %v36_v14, 0  ;;  %v375_v41 = vsel %vm56_vm0, %v2450_v39, 0  ;;  %v2460_v61 = vcombine.low %v2459_v46, %v2459_v46  ;;  %v2455_v2 = vcombine.low %v2454_v47, %v2454_v47  ;;  %v2474_v13 = vld [vmem:[%s3198_s3 + $0x30] sm:$0xff]  ;;  %p2778_p0 = scmp.ne.s32.totalorder %s2424_s27, %s2777_s28  ;;  %p2782_p1 = scmp.lt.s32.totalorder %s2424_s27, %s2424_s27 }
   0xe   :  { %2448 = vmatprep.subr.msk.bf16.mxu0 %vm56_vm0, %v2447_v42  ;;  %v321_v44 = vsel %vm56_vm0, %v2446_v43, 0  ;;  %v2504_v43 = vld [vmem:[%s3198_s3 + $0x60] sm:$0xff]  ;;  %p2783_p2 = scmp.lt.s32.totalorder %s2781_s1, %s2777_s28 }
   0xf   :  { %341 = vmatpush1.bf16.msra.mxu0 %v321_v44 }
  0x10   :  { %2457 = vmatprep.subr.msk.bf16.mxu0 %vm56_vm0, %v2456_v49  ;;  %p2784_p3 = por %p2783_p2, %p2782_p1 }
  0x12   :  { %p2785_p4 = pnand %p2784_p3, %p2778_p0 }
  0xc8   :  { %v2661_v6 = vpop.f32.mrf.mxu1 }
  0xca   :  { %v94_v7 = vpop.f32.mrf.mxu1 }
  0xcc   :  { %v2662_v8 = vpop.f32.mrf.mxu1 }
  0xcd   :  { %v110_v9 = vpack.c.bf16 %v2662_v8, %v2661_v6  ;;  %v2471_v6 = vcombine.high %v2469_v62, %v2469_v62  ;;  %v434_v8 = vsel %vm56_vm0, %v2455_v2, 0 }
  0xce   :  { %v97_v10 = vpop.f32.mrf.mxu1 }
  0xcf   :  { %v109_v11 = vpack.c.bf16 %v97_v10, %v94_v7  ;;  %2663 = vmatprep.subr.bf16.mxu1 %v110_v9  ;;  %v2470_v10 = vcombine.low %v2469_v62, %v2469_v62  ;;  %v2529_v62 = vld [vmem:[%s3198_s3 + $0x88] sm:$0xff] }
  0xd0   :  { %2664 = vmatpush3.bf16.msra.mxu1 %v110_v9  ;;  %v2466_v9 = vcombine.high %v2464_v3, %v2464_v3 }
  0xd1   :  { %2665 = vmatprep.subr.bf16.mxu1 %v109_v11 }
  0xd4   :  { %2666 = vmatpush3.bf16.msra.mxu1 %v109_v11  ;;  %v2479_v11 = vld [vmem:[%s3198_s3 + $0x38] sm:$0xff] }
  0xd5   :  { %2686 = vmatprep.subr.msk.bf16.mxu1 %vm56_vm0, %v36_v14 }
  0xd7   :  { %2668 = vmatmul.mubr.msk.bf16.vlgmr.msra.gmra.mxu1 %vm125_vm2, %v2692_v12 }
  0xd8   :  { %2672 = vmatpush3.bf16.msra.mxu1 %v194_v15  ;;  %v614_v15 = vsel %vm56_vm0, %v2470_v10, 0  ;;  %v2530_v10 = vcombine.low %v2529_v62, %v2529_v62 }
 0x197   :  { %v2669_v16 = vpop.f32.mrf.mxu1 }
 0x198   :  { %v175_v22 = vadd.f32 %v2669_v16, %v2435_v18  ;;  %v2481_v16 = vcombine.high %v2479_v11, %v2479_v11 }
 0x199   :  { %v166_v17 = vpop.f32.mrf.mxu1 }
 0x19a   :  { %v167_v20 = vadd.f32 %v2435_v18, %v166_v17  ;;  %v183_v28 = vmax.f32 %v175_v22, 0.0  ;;  %v2475_v22 = vcombine.low %v2474_v13, %v2474_v13 }
 0x19b   :  { %v2670_v19 = vpop.f32.mrf.mxu1 }
 0x19c   :  { %v178_v21 = vadd.f32 %v2670_v19, %v2435_v18  ;;  %v181_v26 = vmax.f32 %v167_v20, 0.0  ;;  %v2476_v19 = vcombine.high %v2474_v13, %v2474_v13  ;;  %v2480_v20 = vcombine.low %v2479_v11, %v2479_v11  ;;  %v2539_v11 = vld [vmem:[%s3198_s3 + $0x98] sm:$0xff]  ;;  %v2534_v13 = vld [vmem:[%s3198_s3 + $0x90] sm:$0xff] }
 0x19d   :  { %v169_v23 = vpop.f32.mrf.mxu1 }
 0x19e   :  { %v170_v24 = vadd.f32 %v2435_v18, %v169_v23  ;;  %v184_v25 = vmax.f32 %v178_v21, 0.0  ;;  %v2489_v21 = vld [vmem:[%s3198_s3 + $0x48] sm:$0xff]  ;;  %v2484_v23 = vld [vmem:[%s3198_s3 + $0x40] sm:$0xff] }
 0x1a0   :  { %v182_v27 = vmax.f32 %v170_v24, 0.0  ;;  %v186_v30 = vpack.c.bf16 %v184_v25, %v183_v28  ;;  %v734_v25 = vsel %vm56_vm0, %v2480_v20, 0  ;;  %v674_v28 = vsel %vm56_vm0, %v2475_v22, 0 }
 0x1a1   :  { %v2540_v20 = vcombine.low %v2539_v11, %v2539_v11 }
 0x1a2   :  { %v185_v29 = vpack.c.bf16 %v182_v27, %v181_v26  ;;  %v2491_v26 = vcombine.high %v2489_v21, %v2489_v21 }
 0x1a4   :  { %2673 = vmatprep.mubr.msk.bf16.mxu1 %vm49_vm1, %v185_v29  ;;  %v2486_v29 = vcombine.high %v2484_v23, %v2484_v23 }
 0x1a5   :  { %2674 = vmatmul.mubr.msk.bf16.vlgmr.msra.gmra.mxu1 %vm49_vm1, %v186_v30  ;;  %v2490_v30 = vcombine.low %v2489_v21, %v2489_v21  ;;  %v2544_v21 = vld [vmem:[%s3198_s3 + $0xa0] sm:$0xff] }
 0x1a6   :  { %2681 = vmatprep.mubr.msk.bf16.mxu1 %vm125_vm2, %v2691_v5  ;;  %v494_v5 = vsel %vm56_vm0, %v2460_v61, 0 }
 0x265   :  { %v2675_v31 = vpop.f32.mrf.mxu1 }
 0x267   :  { %v230_v32 = vpop.f32.mrf.mxu1 }
 0x269   :  { %v2676_v33 = vpop.f32.mrf.mxu1 }
 0x26a   :  { %v246_v34 = vpack.c.bf16 %v2676_v33, %v2675_v31  ;;  %v2499_v31 = vld [vmem:[%s3198_s3 + $0x58] sm:$0xff]  ;;  %v2494_v33 = vld [vmem:[%s3198_s3 + $0x50] sm:$0xff] }
 0x26b   :  { %v233_v35 = vpop.f32.mrf.mxu1  ;;  %v2496_v39 = vcombine.high %v2494_v33, %v2494_v33  ;;  %v2500_v40 = vcombine.low %v2499_v31, %v2499_v31  ;;  %v2495_v42 = vcombine.low %v2494_v33, %v2494_v33 }
 0x26c   :  { %v245_v36 = vpack.c.bf16 %v233_v35, %v230_v32  ;;  %2677 = vmatprep.subr.bf16.mxu1 %v246_v34  ;;  %v2485_v32 = vcombine.low %v2484_v23, %v2484_v23  ;;  %v854_v35 = vsel %vm56_vm0, %v2490_v30, 0  ;;  %v1455_v23 = vsel %vm56_vm0, %v2540_v20, 0  ;;  %v2554_v30 = vld [vmem:[%s3198_s3 + $0xb0] sm:$0xff] }
 0x26d   :  { %2678 = vmatpush3.bf16.msra.mxu1 %v246_v34  ;;  %v974_v46 = vsel %vm56_vm0, %v2500_v40, 0  ;;  %v914_v49 = vsel %vm56_vm0, %v2495_v42, 0  ;;  %v2564_v40 = vld [vmem:[%s3198_s3 + $0xc0] sm:$0xff] }
 0x26e   :  { %2679 = vmatprep.subr.bf16.mxu1 %v245_v36 }
 0x271   :  { %2680 = vmatpush3.bf16.msra.mxu1 %v245_v36  ;;  %v2501_v36 = vcombine.high %v2499_v31, %v2499_v31 }
 0x272   :  { %2452 = vmatprep.subr.msk.bf16.mxu1 %vm56_vm0, %v2451_v38  ;;  %v794_v38 = vsel %vm56_vm0, %v2485_v32, 0 }
 0x274   :  { %2682 = vmatmul.mubr.msk.bf16.vlgmr.msra.gmra.mxu1 %vm125_vm2, %v2692_v12  ;;  %v2465_v12 = vcombine.low %v2464_v3, %v2464_v3 }
 0x275   :  { %395 = vmatpush1.bf16.msra.mxu1 %v375_v41  ;;  %412 = vmatprep.mubr.bf16.mxu1 %v2799_v45  ;;  %v2509_v41 = vld [vmem:[%s3198_s3 + $0x68] sm:$0xff] }
 0x276   :  { %2462 = vmatprep.subr.msk.bf16.mxu1 %vm56_vm0, %v2461_v48  ;;  %v554_v18 = vsel %vm56_vm0, %v2465_v12, 0  ;;  %v2511_v47 = vcombine.high %v2509_v41, %v2509_v41 }
 0x334   :  { %v2683_v50 = vpop.f32.mrf.mxu1 }
 0x335   :  { %v294_v53 = vadd.f32 %v2683_v50, %v2442_v51  ;;  %v2506_v50 = vcombine.high %v2504_v43, %v2504_v43 }
 0x336   :  { %v285_v52 = vpop.f32.mrf.mxu1 }
 0x337   :  { %v286_v55 = vadd.f32 %v2442_v51, %v285_v52  ;;  %v302_v58 = vmax.f32 %v294_v53, 0.0  ;;  %v2519_v52 = vld [vmem:[%s3198_s3 + $0x78] sm:$0xff]  ;;  %v2505_v53 = vcombine.low %v2504_v43, %v2504_v43 }
 0x338   :  { %v2684_v54 = vpop.f32.mrf.mxu1  ;;  %v2520_v61 = vcombine.low %v2519_v52, %v2519_v52 }
 0x339   :  { %v297_v56 = vadd.f32 %v2684_v54, %v2442_v51  ;;  %v300_v63 = vmax.f32 %v286_v55, 0.0  ;;  %v2514_v54 = vld [vmem:[%s3198_s3 + $0x70] sm:$0xff] }
 0x33a   :  { %v288_v57 = vpop.f32.mrf.mxu1  ;;  %v1214_v3 = vsel %vm56_vm0, %v2520_v61, 0  ;;  %v2584_v61 = vld [vmem:[%s3198_s3 + $0xe0] sm:$0xff] }
 0x33b   :  { %v303_v59 = vmax.f32 %v297_v56, 0.0  ;;  %v289_v60 = vadd.f32 %v2442_v51, %v288_v57  ;;  %v2510_v51 = vcombine.low %v2509_v41, %v2509_v41  ;;  %v2521_v57 = vcombine.high %v2519_v52, %v2519_v52 }
 0x33d   :  { %v2895_v0 = vpack.c.bf16 %v303_v59, %v302_v58  ;;  %v301_v1 = vmax.f32 %v289_v60, 0.0  ;;  %v1094_v56 = vsel %vm56_vm0, %v2510_v51, 0  ;;  %v1034_v59 = vsel %vm56_vm0, %v2505_v53, 0  ;;  %v2574_v51 = vld [vmem:[%s3198_s3 + $0xd0] sm:$0xff] }
 0x33e   :  { %v2516_v60 = vcombine.high %v2514_v54, %v2514_v54 }
 0x33f   :  { %v2900_v4 = vpack.c.bf16 %v301_v1, %v300_v63  ;;  %v2515_v63 = vcombine.low %v2514_v54, %v2514_v54  ;;  %v2524_v1 = vld [vmem:[%s3198_s3 + $0x80] sm:$0xff]  ;;  %v3034_v22 = vshrl.u32 %v2895_v0, 16 }
 0x340   :  { %v2525_v12 = vcombine.low %v2524_v1, %v2524_v1 }
 0x341   :  { %2453 = vmatmul.mubr.msk.bf16.vlgmr.msra.gmra.mxu1 %vm49_vm1, %v2900_v4  ;;  %v2906_v7 = vshrl.u32 %v2900_v4, 16  ;;  %v424_v17 = vrot.slane %v2900_v4, 1  ;;  %v544_v27 = vrot.slane %v2900_v4, 2  ;;  %v664_v37 = vrot.slane %v2900_v4, 3 }
 0x342   :  { %514 = vmatpush1.bf16.msra.mxu1 %v494_v5  ;;  %531 = vmatprep.mubr.bf16.mxu1 %v2799_v45  ;;  %v784_v48 = vrot.slane %v2900_v4, 4  ;;  %v904_v58 = vrot.slane %v2900_v4, 5  ;;  %v2531_v5 = vcombine.high %v2529_v62, %v2529_v62  ;;  %v1445_v31 = vrot.slane %v3034_v22, 1 }
 0x343   :  { %2449 = vmatmul.mubr.msk.bf16.vlgmr.msra.gmra.mxu0 %vm49_vm1, %v2906_v7  ;;  %2472 = vmatprep.subr.msk.bf16.mxu1 %vm56_vm0, %v2471_v6  ;;  %v484_v14 = vrot.slane %v2906_v7, 1  ;;  %v604_v24 = vrot.slane %v2906_v7, 2  ;;  %v724_v34 = vrot.slane %v2906_v7, 3  ;;  %v844_v44 = vrot.slane %v2906_v7, 4 }
 0x344   :  { %454 = vmatpush1.bf16.msra.mxu0 %v434_v8  ;;  %471 = vmatprep.mubr.bf16.mxu0 %v2799_v45  ;;  %v964_v55 = vrot.slane %v2906_v7, 5  ;;  %v1084_v2 = vrot.slane %v2906_v7, 6  ;;  %v1024_v6 = vrot.slane %v2900_v4, 6  ;;  %v1154_v8 = vsel %vm56_vm0, %v2515_v63, 0 }
 0x345   :  { %2467 = vmatprep.subr.msk.bf16.mxu0 %vm56_vm0, %v2466_v9  ;;  %v2526_v9 = vcombine.high %v2524_v1, %v2524_v1  ;;  %v1565_v41 = vrot.slane %v3034_v22, 2  ;;  %v1685_v52 = vrot.slane %v3034_v22, 3  ;;  %v1805_v62 = vrot.slane %v3034_v22, 4 }
 0x349   :  { %2463 = vmatmul.mubr.msk.bf16.vlgmr.msra.gmra.mxu1 %vm49_vm1, %v484_v14  ;;  %v1204_v14 = vrot.slane %v2906_v7, 7  ;;  %v2549_v7 = vld [vmem:[%s3198_s3 + $0xa8] sm:$0xff] }
 0x34a   :  { %634 = vmatpush1.bf16.msra.mxu1 %v614_v15  ;;  %651 = vmatprep.mubr.bf16.mxu1 %v2799_v45  ;;  %v1334_v15 = vsel %vm56_vm0, %v2530_v10, 0  ;;  %v2594_v10 = vld [vmem:[%s3198_s3 + $0xf0] sm:$0xff] }
 0x34b   :  { %2458 = vmatmul.mubr.msk.bf16.vlgmr.msra.gmra.mxu0 %vm49_vm1, %v424_v17  ;;  %2482 = vmatprep.subr.msk.bf16.mxu1 %vm56_vm0, %v2481_v16  ;;  %v2541_v16 = vcombine.high %v2539_v11, %v2539_v11  ;;  %v1144_v17 = vrot.slane %v2900_v4, 7  ;;  %v2535_v4 = vcombine.low %v2534_v13, %v2534_v13  ;;  %v1925_v11 = vrot.slane %v3034_v22, 5 }
 0x34c   :  { %574 = vmatpush1.bf16.msra.mxu0 %v554_v18  ;;  %591 = vmatprep.mubr.bf16.mxu0 %v2799_v45  ;;  %v1273_v18 = vsel %vm56_vm0, %v2525_v12, 0 }
 0x34d   :  { %2477 = vmatprep.subr.msk.bf16.mxu0 %vm56_vm0, %v2476_v19  ;;  %v2536_v19 = vcombine.high %v2534_v13, %v2534_v13 }
 0x351   :  { %2473 = vmatmul.mubr.msk.bf16.vlgmr.msra.gmra.mxu1 %vm49_vm1, %v604_v24  ;;  %v2551_v24 = vcombine.high %v2549_v7, %v2549_v7 }
 0x352   :  { %754 = vmatpush1.bf16.msra.mxu1 %v734_v25  ;;  %771 = vmatprep.mubr.bf16.mxu1 %v2799_v45  ;;  %v1395_v25 = vsel %vm56_vm0, %v2535_v4, 0 }
 0x353   :  { %2468 = vmatmul.mubr.msk.bf16.vlgmr.msra.gmra.mxu0 %vm49_vm1, %v544_v27  ;;  %2492 = vmatprep.subr.msk.bf16.mxu1 %vm56_vm0, %v2491_v26  ;;  %v2546_v26 = vcombine.high %v2544_v21, %v2544_v21  ;;  %v2550_v27 = vcombine.low %v2549_v7, %v2549_v7  ;;  %v1985_v7 = vrot.slane %v2895_v0, 6 }
 0x354   :  { %694 = vmatpush1.bf16.msra.mxu0 %v674_v28  ;;  %711 = vmatprep.mubr.bf16.mxu0 %v2799_v45  ;;  %v2559_v28 = vld [vmem:[%s3198_s3 + $0xb8] sm:$0xff] }
 0x355   :  { %2487 = vmatprep.subr.msk.bf16.mxu0 %vm56_vm0, %v2486_v29  ;;  %v2545_v29 = vcombine.low %v2544_v21, %v2544_v21  ;;  %v1575_v32 = vsel %vm56_vm0, %v2550_v27, 0  ;;  %v2561_v33 = vcombine.high %v2559_v28, %v2559_v28  ;;  %v2165_v21 = vrot.slane %v3034_v22, 7  ;;  %v2763_v27 = vld [vmem:[%s3200_s5 + $0x60] sm:$0xff]  }
 0x359   :  { %2483 = vmatmul.mubr.msk.bf16.vlgmr.msra.gmra.mxu1 %vm49_vm1, %v724_v34  ;;  %v1385_v34 = vrot.slane %v2895_v0, 1 }
 0x35a   :  { %874 = vmatpush1.bf16.msra.mxu1 %v854_v35  ;;  %891 = vmatprep.mubr.bf16.mxu1 %v2799_v45  ;;  %v1515_v35 = vsel %vm56_vm0, %v2545_v29, 0  ;;  %v2765_v29 = vld [vmem:[%s3200_s5 + $0x58] sm:$0xff]  }
 0x35b   :  { %2478 = vmatmul.mubr.msk.bf16.vlgmr.msra.gmra.mxu0 %vm49_vm1, %v664_v37  ;;  %2502 = vmatprep.subr.msk.bf16.mxu1 %vm56_vm0, %v2501_v36  ;;  %v2556_v36 = vcombine.high %v2554_v30, %v2554_v30  ;;  %v2560_v37 = vcombine.low %v2559_v28, %v2559_v28  ;;  %v2764_v28 = vld [vmem:[%s3200_s5 + $0x20] sm:$0xff]  }
 0x35c   :  { %814 = vmatpush1.bf16.msra.mxu0 %v794_v38  ;;  %831 = vmatprep.mubr.bf16.mxu0 %v2799_v45  ;;  %v2569_v38 = vld [vmem:[%s3198_s3 + $0xc8] sm:$0xff] }
 0x35d   :  { %2497 = vmatprep.subr.msk.bf16.mxu0 %vm56_vm0, %v2496_v39  ;;  %v2555_v39 = vcombine.low %v2554_v30, %v2554_v30  ;;  %v1695_v42 = vsel %vm56_vm0, %v2560_v37, 0  ;;  %v2571_v43 = vcombine.high %v2569_v38, %v2569_v38  ;;  %v2766_v30 = vld [vmem:[%s3200_s5 + $0x18] sm:$0xff]   ;;  %v2769_v37 = vld [vmem:[%s3200_s5 + $0x48] sm:$0xff]  }
 0x361   :  { %2493 = vmatmul.mubr.msk.bf16.vlgmr.msra.gmra.mxu1 %vm49_vm1, %v844_v44  ;;  %v1505_v44 = vrot.slane %v2895_v0, 2 }
 0x362   :  { %994 = vmatpush1.bf16.msra.mxu1 %v974_v46  ;;  %1011 = vmatprep.mubr.bf16.mxu1 %v2799_v45  ;;  %v1635_v46 = vsel %vm56_vm0, %v2555_v39, 0 }
 0x363   :  { %2488 = vmatmul.mubr.msk.bf16.vlgmr.msra.gmra.mxu0 %vm49_vm1, %v784_v48  ;;  %2512 = vmatprep.subr.msk.bf16.mxu1 %vm56_vm0, %v2511_v47  ;;  %v2566_v47 = vcombine.high %v2564_v40, %v2564_v40  ;;  %v2570_v48 = vcombine.low %v2569_v38, %v2569_v38 }
 0x364   :  { %934 = vmatpush1.bf16.msra.mxu0 %v914_v49  ;;  %951 = vmatprep.mubr.bf16.mxu0 %v2799_v45  ;;  %v2579_v49 = vld [vmem:[%s3198_s3 + $0xd8] sm:$0xff] }
 0x365   :  { %2507 = vmatprep.subr.msk.bf16.mxu0 %vm56_vm0, %v2506_v50  ;;  %v2565_v50 = vcombine.low %v2564_v40, %v2564_v40  ;;  %v1815_v53 = vsel %vm56_vm0, %v2570_v48, 0  ;;  %v2581_v54 = vcombine.high %v2579_v49, %v2579_v49  ;;  %v2770_v40 = vld [vmem:[%s3200_s5 + $0x8] sm:$0xff]  }
 0x369   :  { %2503 = vmatmul.mubr.msk.bf16.vlgmr.msra.gmra.mxu1 %vm49_vm1, %v964_v55  ;;  %v1625_v55 = vrot.slane %v2895_v0, 3 }
 0x36a   :  { %1114 = vmatpush1.bf16.msra.mxu1 %v1094_v56  ;;  %1131 = vmatprep.mubr.bf16.mxu1 %v2799_v45  ;;  %v1755_v56 = vsel %vm56_vm0, %v2565_v50, 0 }
 0x36b   :  { %2498 = vmatmul.mubr.msk.bf16.vlgmr.msra.gmra.mxu0 %vm49_vm1, %v904_v58  ;;  %2522 = vmatprep.subr.msk.bf16.mxu1 %vm56_vm0, %v2521_v57  ;;  %v2576_v57 = vcombine.high %v2574_v51, %v2574_v51  ;;  %v2580_v58 = vcombine.low %v2579_v49, %v2579_v49 }
 0x36c   :  { %1054 = vmatpush1.bf16.msra.mxu0 %v1034_v59  ;;  %1071 = vmatprep.mubr.bf16.mxu0 %v2799_v45  ;;  %v2589_v59 = vld [vmem:[%s3198_s3 + $0xe8] sm:$0xff] }
 0x36d   :  { %2517 = vmatprep.subr.msk.bf16.mxu0 %vm56_vm0, %v2516_v60  ;;  %v2575_v60 = vcombine.low %v2574_v51, %v2574_v51  ;;  %v1935_v63 = vsel %vm56_vm0, %v2580_v58, 0  ;;  %v2591_v1 = vcombine.high %v2589_v59, %v2589_v59 }
 0x371   :  { %2513 = vmatmul.mubr.msk.bf16.vlgmr.msra.gmra.mxu1 %vm49_vm1, %v1084_v2  ;;  %v1745_v2 = vrot.slane %v2895_v0, 4 }
 0x372   :  { %1234 = vmatpush1.bf16.msra.mxu1 %v1214_v3  ;;  %1251 = vmatprep.mubr.bf16.mxu1 %v2799_v45  ;;  %v1875_v3 = vsel %vm56_vm0, %v2575_v60, 0 }
 0x373   :  { %2508 = vmatmul.mubr.msk.bf16.vlgmr.msra.gmra.mxu0 %vm49_vm1, %v1024_v6  ;;  %2532 = vmatprep.subr.msk.bf16.mxu1 %vm56_vm0, %v2531_v5  ;;  %v2586_v5 = vcombine.high %v2584_v61, %v2584_v61  ;;  %v2590_v6 = vcombine.low %v2589_v59, %v2589_v59 }
 0x374   :  { %1174 = vmatpush1.bf16.msra.mxu0 %v1154_v8  ;;  %1191 = vmatprep.mubr.bf16.mxu0 %v2799_v45  ;;  %v2599_v8 = vld [vmem:[%s3198_s3 + $0xf8] sm:$0xff] }
 0x375   :  { %2527 = vmatprep.subr.msk.bf16.mxu0 %vm56_vm0, %v2526_v9  ;;  %v2585_v9 = vcombine.low %v2584_v61, %v2584_v61  ;;  %v2055_v12 = vsel %vm56_vm0, %v2590_v6, 0  ;;  %v2601_v13 = vcombine.high %v2599_v8, %v2599_v8 }
 0x379   :  { %2523 = vmatmul.mubr.msk.bf16.vlgmr.msra.gmra.mxu1 %vm49_vm1, %v1204_v14  ;;  %v1865_v14 = vrot.slane %v2895_v0, 5 }
 0x37a   :  { %1354 = vmatpush1.bf16.msra.mxu1 %v1334_v15  ;;  %1371 = vmatprep.mubr.bf16.mxu1 %v2799_v45  ;;  %v1995_v15 = vsel %vm56_vm0, %v2585_v9, 0 }
 0x37b   :  { %2518 = vmatmul.mubr.msk.bf16.vlgmr.msra.gmra.mxu0 %vm49_vm1, %v1144_v17  ;;  %2542 = vmatprep.subr.msk.bf16.mxu1 %vm56_vm0, %v2541_v16  ;;  %v2596_v16 = vcombine.high %v2594_v10, %v2594_v10  ;;  %v2600_v17 = vcombine.low %v2599_v8, %v2599_v8 }
 0x37c   :  { %1293 = vmatpush1.bf16.msra.mxu0 %v1273_v18  ;;  %1310 = vmatprep.mubr.bf16.mxu0 %v2799_v45  ;;  %v2595_v18 = vcombine.low %v2594_v10, %v2594_v10 }
 0x37d   :  { %2537 = vmatprep.subr.msk.bf16.mxu0 %vm56_vm0, %v2536_v19  ;;  %v2045_v19 = vrot.slane %v3034_v22, 6  ;;  %v2175_v20 = vsel %vm56_vm0, %v2600_v17, 0 }
 0x37e   :  { %v2115_v4 = vsel %vm56_vm0, %v2595_v18, 0 }
 0x381   :  { %2533 = vmatmul.mubr.msk.bf16.vlgmr.msra.gmra.mxu1 %vm49_vm1, %v3034_v22  ;;  %v2761_v22 = vld [vmem:[%s3200_s5 + $0x68] sm:$0xff]  }
 0x382   :  { %1475 = vmatpush1.bf16.msra.mxu1 %v1455_v23  ;;  %1492 = vmatprep.mubr.bf16.mxu1 %v2799_v45  ;;  %v2105_v23 = vrot.slane %v2895_v0, 7 }
 0x383   :  { %2528 = vmatmul.mubr.msk.bf16.vlgmr.msra.gmra.mxu0 %vm49_vm1, %v2895_v0  ;;  %2552 = vmatprep.subr.msk.bf16.mxu1 %vm56_vm0, %v2551_v24  ;;  %v2757_v24 = vld [vmem:[%s3200_s5 + $0x78] sm:$0xff]   ;;  %v2760_v0 = vld [vmem:[%s3200_s5 + $0x30] sm:$0xff]  }
 0x384   :  { %1415 = vmatpush1.bf16.msra.mxu0 %v1395_v25  ;;  %1432 = vmatprep.mubr.bf16.mxu0 %v2799_v45  ;;  %v2758_v25 = vld [vmem:[%s3200_s5 + $0x38] sm:$0xff]  }
 0x385   :  { %2547 = vmatprep.subr.msk.bf16.mxu0 %vm56_vm0, %v2546_v26  ;;  %v2762_v26 = vld [vmem:[%s3200_s5 + $0x28] sm:$0xff]  }
 0x389   :  { %2543 = vmatmul.mubr.msk.bf16.vlgmr.msra.gmra.mxu1 %vm49_vm1, %v1445_v31 }
 0x38a   :  { %1595 = vmatpush1.bf16.msra.mxu1 %v1575_v32  ;;  %1612 = vmatprep.mubr.bf16.mxu1 %v2799_v45  ;;  %v2767_v32 = vld [vmem:[%s3200_s5 + $0x50] sm:$0xff]  }
 0x38b   :  { %2538 = vmatmul.mubr.msk.bf16.vlgmr.msra.gmra.mxu0 %vm49_vm1, %v1385_v34  ;;  %2562 = vmatprep.subr.msk.bf16.mxu1 %vm56_vm0, %v2561_v33 }
 0x38c   :  { %1535 = vmatpush1.bf16.msra.mxu0 %v1515_v35  ;;  %1552 = vmatprep.mubr.bf16.mxu0 %v2799_v45  ;;  %v2768_v35 = vld [vmem:[%s3200_s5 + $0x10] sm:$0xff]  }
 0x38d   :  { %2557 = vmatprep.subr.msk.bf16.mxu0 %vm56_vm0, %v2556_v36 }
 0x391   :  { %2553 = vmatmul.mubr.msk.bf16.vlgmr.msra.gmra.mxu1 %vm49_vm1, %v1565_v41  ;;  %v2771_v41 = vld [vmem:[%s3200_s5 + $0x40] sm:$0xff]  }
 0x392   :  { %1715 = vmatpush1.bf16.msra.mxu1 %v1695_v42  ;;  %1732 = vmatprep.mubr.bf16.mxu1 %v2799_v45 }
 0x393   :  { %2548 = vmatmul.mubr.msk.bf16.vlgmr.msra.gmra.mxu0 %vm49_vm1, %v1505_v44  ;;  %2572 = vmatprep.subr.msk.bf16.mxu1 %vm56_vm0, %v2571_v43 }
 0x394   :  { %1655 = vmatpush1.bf16.msra.mxu0 %v1635_v46  ;;  %1672 = vmatprep.mubr.bf16.mxu0 %v2799_v45 }
 0x395   :  { %2567 = vmatprep.subr.msk.bf16.mxu0 %vm56_vm0, %v2566_v47  ;;  %v2772_v47 = vld [vmem:[%s3200_s5] sm:$0xff]  }
 0x399   :  { %2563 = vmatmul.mubr.msk.bf16.vlgmr.msra.gmra.mxu1 %vm49_vm1, %v1685_v52 }
 0x39a   :  { %1835 = vmatpush1.bf16.msra.mxu1 %v1815_v53  ;;  %1852 = vmatprep.mubr.bf16.mxu1 %v2799_v45 }
 0x39b   :  { %2558 = vmatmul.mubr.msk.bf16.vlgmr.msra.gmra.mxu0 %vm49_vm1, %v1625_v55  ;;  %2582 = vmatprep.subr.msk.bf16.mxu1 %vm56_vm0, %v2581_v54 }
 0x39c   :  { %1775 = vmatpush1.bf16.msra.mxu0 %v1755_v56  ;;  %1792 = vmatprep.mubr.bf16.mxu0 %v2799_v45 }
 0x39d   :  { %2577 = vmatprep.subr.msk.bf16.mxu0 %vm56_vm0, %v2576_v57 }
 0x3a1   :  { %2573 = vmatmul.mubr.msk.bf16.vlgmr.msra.gmra.mxu1 %vm49_vm1, %v1805_v62 }
 0x3a2   :  { %1955 = vmatpush1.bf16.msra.mxu1 %v1935_v63  ;;  %1972 = vmatprep.mubr.bf16.mxu1 %v2799_v45 }
 0x3a3   :  { %2568 = vmatmul.mubr.msk.bf16.vlgmr.msra.gmra.mxu0 %vm49_vm1, %v1745_v2  ;;  %2592 = vmatprep.subr.msk.bf16.mxu1 %vm56_vm0, %v2591_v1 }
 0x3a4   :  { %1895 = vmatpush1.bf16.msra.mxu0 %v1875_v3  ;;  %1912 = vmatprep.mubr.bf16.mxu0 %v2799_v45 }
 0x3a5   :  { %2587 = vmatprep.subr.msk.bf16.mxu0 %vm56_vm0, %v2586_v5 }
 0x3a9   :  { %2583 = vmatmul.mubr.msk.bf16.vlgmr.msra.gmra.mxu1 %vm49_vm1, %v1925_v11 }
 0x3aa   :  { %2075 = vmatpush1.bf16.msra.mxu1 %v2055_v12  ;;  %2092 = vmatprep.mubr.bf16.mxu1 %v2799_v45 }
 0x3ab   :  { %2578 = vmatmul.mubr.msk.bf16.vlgmr.msra.gmra.mxu0 %vm49_vm1, %v1865_v14  ;;  %2602 = vmatprep.subr.msk.bf16.mxu1 %vm56_vm0, %v2601_v13 }
 0x3ac   :  { %2015 = vmatpush1.bf16.msra.mxu0 %v1995_v15  ;;  %2032 = vmatprep.mubr.bf16.mxu0 %v2799_v45 }
 0x3ad   :  { %2597 = vmatprep.subr.msk.bf16.mxu0 %vm56_vm0, %v2596_v16 }
 0x3b1   :  { %2593 = vmatmul.mubr.msk.bf16.vlgmr.msra.gmra.mxu1 %vm49_vm1, %v2045_v19 }
 0x3b2   :  { %2195 = vmatpush1.bf16.msra.mxu1 %v2175_v20  ;;  %2212 = vmatprep.mubr.bf16.mxu1 %v2799_v45 }
 0x3b3   :  { %2588 = vmatmul.mubr.msk.bf16.vlgmr.msra.gmra.mxu0 %vm49_vm1, %v1985_v7 }
 0x3b4   :  { %2135 = vmatpush1.bf16.msra.mxu0 %v2115_v4  ;;  %2152 = vmatprep.mubr.bf16.mxu0 %v2799_v45  ;;  %v2759_v45 = vld [vmem:[%s3200_s5 + $0x70] sm:$0xff]  }
 0x3b5   :  { %2635 = vmatprep.subr.bf16.mxu0 %v2757_v24 }
 0x3b9   :  { %2603 = vmatmul.mubr.msk.bf16.vlgmr.msra.gmra.mxu1 %vm49_vm1, %v2165_v21 }
 0x3bb   :  { %2598 = vmatmul.mubr.msk.bf16.vlgmr.msra.gmra.mxu0 %vm49_vm1, %v2105_v23 }
 0x3bc   :  { %2636 = vmatpush3.bf16.msra.mxu0 %v2758_v25 }
 0x3bd   :  { %2637 = vmatprep.subr.bf16.mxu0 %v2759_v45 }
 0x3c0   :  { %2638 = vmatpush3.bf16.msra.mxu0 %v2760_v0 }
 0x3c1   :  { %2639 = vmatprep.subr.bf16.mxu0 %v2761_v22 }
 0x3c4   :  { %2640 = vmatpush3.bf16.msra.mxu0 %v2762_v26 }
 0x3c5   :  { %2641 = vmatprep.subr.bf16.mxu0 %v2763_v27 }
 0x3c8   :  { %2642 = vmatpush3.bf16.msra.mxu0 %v2764_v28 }
 0x3c9   :  { %2643 = vmatprep.subr.bf16.mxu0 %v2765_v29 }
 0x3cc   :  { %2644 = vmatpush3.bf16.msra.mxu0 %v2766_v30 }
 0x3cd   :  { %2645 = vmatprep.subr.bf16.mxu0 %v2767_v32 }
 0x3d0   :  { %2646 = vmatpush3.bf16.msra.mxu0 %v2768_v35 }
 0x3d1   :  { %2647 = vmatprep.subr.bf16.mxu0 %v2769_v37 }
 0x3d4   :  { %2648 = vmatpush3.bf16.msra.mxu0 %v2770_v40 }
 0x3d5   :  { %2649 = vmatprep.subr.bf16.mxu0 %v2771_v41 }
 0x3d8   :  { %2650 = vmatpush3.bf16.msra.mxu0 %v2772_v47 }
 0x401   :  { %v414_v31 = vpop.f32.mrf.mxu1 }
 0x403   :  { %v360_v33 = vpop.f32.mrf.mxu0  ;;  %v416_v34 = vpop.f32.mrf.mxu1 }
 0x404   :  { %v415_v36 = vadd.f32 %v414_v31, %v360_v33 }
 0x405   :  { %v362_v38 = vpop.f32.mrf.mxu0  ;;  %v418_v39 = vpop.f32.mrf.mxu1 }
 0x406   :  { %v417_v17 = vadd.f32 %v416_v34, %v362_v38 }
 0x407   :  { %v364_v42 = vpop.f32.mrf.mxu0  ;;  %v419_v43 = vpop.f32.mrf.mxu1 }
 0x409   :  { %v365_v44 = vpop.f32.mrf.mxu0  ;;  %v533_v46 = vpop.f32.mrf.mxu1 }
 0x40b   :  { %v473_v48 = vpop.f32.mrf.mxu0  ;;  %v535_v49 = vpop.f32.mrf.mxu1 }
 0x40c   :  { %v480_v18 = vadd.f32 %v473_v48, %v415_v36 }
 0x40d   :  { %v475_v50 = vpop.f32.mrf.mxu0  ;;  %v537_v51 = vpop.f32.mrf.mxu1 }
 0x40e   :  { %v481_v7 = vadd.f32 %v475_v50, %v417_v17  ;;  %v540_v23 = vadd.f32 %v533_v46, %v480_v18 }
 0x40f   :  { %v477_v52 = vpop.f32.mrf.mxu0  ;;  %v538_v53 = vpop.f32.mrf.mxu1 }
 0x410   :  { %v541_v0 = vadd.f32 %v535_v49, %v481_v7 }
 0x411   :  { %v478_v54 = vpop.f32.mrf.mxu0  ;;  %v653_v55 = vpop.f32.mrf.mxu1 }
 0x413   :  { %v593_v56 = vpop.f32.mrf.mxu0  ;;  %v655_v57 = vpop.f32.mrf.mxu1 }
 0x414   :  { %v600_v45 = vadd.f32 %v593_v56, %v540_v23 }
 0x415   :  { %v595_v58 = vpop.f32.mrf.mxu0  ;;  %v657_v59 = vpop.f32.mrf.mxu1 }
 0x416   :  { %v601_v27 = vadd.f32 %v595_v58, %v541_v0  ;;  %v660_v30 = vadd.f32 %v653_v55, %v600_v45 }
 0x417   :  { %v597_v60 = vpop.f32.mrf.mxu0  ;;  %v658_v61 = vpop.f32.mrf.mxu1 }
 0x418   :  { %v661_v34 = vadd.f32 %v655_v57, %v601_v27 }
 0x419   :  { %v598_v62 = vpop.f32.mrf.mxu0  ;;  %v773_v63 = vpop.f32.mrf.mxu1 }
 0x41b   :  { %v713_v1 = vpop.f32.mrf.mxu0  ;;  %v775_v2 = vpop.f32.mrf.mxu1 }
 0x41c   :  { %v720_v33 = vadd.f32 %v713_v1, %v660_v30 }
 0x41d   :  { %v715_v3 = vpop.f32.mrf.mxu0  ;;  %v777_v5 = vpop.f32.mrf.mxu1 }
 0x41e   :  { %v721_v37 = vadd.f32 %v715_v3, %v661_v34  ;;  %v780_v40 = vadd.f32 %v773_v63, %v720_v33 }
 0x41f   :  { %v717_v6 = vpop.f32.mrf.mxu0  ;;  %v778_v8 = vpop.f32.mrf.mxu1 }
 0x420   :  { %v781_v44 = vadd.f32 %v775_v2, %v721_v37 }
 0x421   :  { %v718_v9 = vpop.f32.mrf.mxu0  ;;  %v893_v10 = vpop.f32.mrf.mxu1 }
 0x423   :  { %v833_v11 = vpop.f32.mrf.mxu0  ;;  %v895_v12 = vpop.f32.mrf.mxu1 }
 0x424   :  { %v840_v43 = vadd.f32 %v833_v11, %v780_v40 }
 0x425   :  { %v835_v13 = vpop.f32.mrf.mxu0  ;;  %v897_v14 = vpop.f32.mrf.mxu1 }
 0x426   :  { %v841_v48 = vadd.f32 %v835_v13, %v781_v44  ;;  %v900_v51 = vadd.f32 %v893_v10, %v840_v43 }
 0x427   :  { %v837_v15 = vpop.f32.mrf.mxu0  ;;  %v898_v16 = vpop.f32.mrf.mxu1 }
 0x428   :  { %v901_v55 = vadd.f32 %v895_v12, %v841_v48 }
 0x429   :  { %v838_v19 = vpop.f32.mrf.mxu0  ;;  %v1013_v20 = vpop.f32.mrf.mxu1 }
 0x42b   :  { %v953_v4 = vpop.f32.mrf.mxu0  ;;  %v1015_v21 = vpop.f32.mrf.mxu1 }
 0x42c   :  { %v960_v54 = vadd.f32 %v953_v4, %v900_v51 }
 0x42d   :  { %v955_v24 = vpop.f32.mrf.mxu0  ;;  %v1017_v25 = vpop.f32.mrf.mxu1 }
 0x42e   :  { %v961_v58 = vadd.f32 %v955_v24, %v901_v55  ;;  %v1020_v61 = vadd.f32 %v1013_v20, %v960_v54 }
 0x42f   :  { %v957_v22 = vpop.f32.mrf.mxu0  ;;  %v1018_v26 = vpop.f32.mrf.mxu1 }
 0x430   :  { %v1021_v2 = vadd.f32 %v1015_v21, %v961_v58 }
 0x431   :  { %v958_v28 = vpop.f32.mrf.mxu0  ;;  %v1133_v29 = vpop.f32.mrf.mxu1 }
 0x433   :  { %v1073_v31 = vpop.f32.mrf.mxu0  ;;  %v1135_v32 = vpop.f32.mrf.mxu1 }
 0x434   :  { %v1080_v1 = vadd.f32 %v1073_v31, %v1020_v61 }
 0x435   :  { %v1075_v35 = vpop.f32.mrf.mxu0  ;;  %v1137_v36 = vpop.f32.mrf.mxu1 }
 0x436   :  { %v1081_v6 = vadd.f32 %v1075_v35, %v1021_v2  ;;  %v1140_v10 = vadd.f32 %v1133_v29, %v1080_v1 }
 0x437   :  { %v1077_v38 = vpop.f32.mrf.mxu0  ;;  %v1138_v39 = vpop.f32.mrf.mxu1 }
 0x438   :  { %v1141_v12 = vadd.f32 %v1135_v32, %v1081_v6 }
 0x439   :  { %v1078_v41 = vpop.f32.mrf.mxu0  ;;  %v1253_v42 = vpop.f32.mrf.mxu1 }
 0x43b   :  { %v1193_v46 = vpop.f32.mrf.mxu0  ;;  %v1255_v47 = vpop.f32.mrf.mxu1 }
 0x43c   :  { %v1200_v14 = vadd.f32 %v1193_v46, %v1140_v10 }
 0x43d   :  { %v1195_v49 = vpop.f32.mrf.mxu0  ;;  %v1257_v50 = vpop.f32.mrf.mxu1 }
 0x43e   :  { %v1201_v17 = vadd.f32 %v1195_v49, %v1141_v12  ;;  %v1260_v20 = vadd.f32 %v1253_v42, %v1200_v14 }
 0x43f   :  { %v1197_v52 = vpop.f32.mrf.mxu0  ;;  %v1258_v53 = vpop.f32.mrf.mxu1 }
 0x440   :  { %v1261_v21 = vadd.f32 %v1255_v47, %v1201_v17 }
 0x441   :  { %v1198_v56 = vpop.f32.mrf.mxu0  ;;  %v1373_v57 = vpop.f32.mrf.mxu1 }
 0x443   :  { %v1312_v59 = vpop.f32.mrf.mxu0  ;;  %v1375_v60 = vpop.f32.mrf.mxu1 }
 0x444   :  { %v1319_v23 = vadd.f32 %v1312_v59, %v1260_v20 }
 0x445   :  { %v1314_v62 = vpop.f32.mrf.mxu0  ;;  %v1377_v63 = vpop.f32.mrf.mxu1 }
 0x446   :  { %v1320_v45 = vadd.f32 %v1314_v62, %v1261_v21  ;;  %v1380_v26 = vadd.f32 %v1373_v57, %v1319_v23 }
 0x447   :  { %v1316_v3 = vpop.f32.mrf.mxu0  ;;  %v1378_v5 = vpop.f32.mrf.mxu1 }
 0x448   :  { %v1381_v30 = vadd.f32 %v1375_v60, %v1320_v45 }
 0x449   :  { %v1317_v8 = vpop.f32.mrf.mxu0  ;;  %v1494_v9 = vpop.f32.mrf.mxu1 }
 0x44b   :  { %v1434_v11 = vpop.f32.mrf.mxu0  ;;  %v1496_v13 = vpop.f32.mrf.mxu1 }
 0x44c   :  { %v1441_v29 = vadd.f32 %v1434_v11, %v1380_v26  ;;  %v2225_v11 = vlaneseq }
 0x44d   :  { %v1436_v15 = vpop.f32.mrf.mxu0  ;;  %v1498_v16 = vpop.f32.mrf.mxu1 }
 0x44e   :  { %v1442_v33 = vadd.f32 %v1436_v15, %v1381_v30  ;;  %v1501_v36 = vadd.f32 %v1494_v9, %v1441_v29 }
 0x44f   :  { %v1438_v18 = vpop.f32.mrf.mxu0  ;;  %v1499_v19 = vpop.f32.mrf.mxu1 }
 0x450   :  { %v1502_v40 = vadd.f32 %v1496_v13, %v1442_v33  ;;  %v2226_v18 = vshrl.u32 %v2225_v11, 7 }
 0x451   :  { %v1439_v7 = vpop.f32.mrf.mxu0  ;;  %v1614_v4 = vpop.f32.mrf.mxu1 }
 0x453   :  { %v1554_v24 = vpop.f32.mrf.mxu0  ;;  %v1616_v25 = vpop.f32.mrf.mxu1 }
 0x454   :  { %v1561_v39 = vadd.f32 %v1554_v24, %v1501_v36 }
 0x455   :  { %v1556_v0 = vpop.f32.mrf.mxu0  ;;  %v1618_v22 = vpop.f32.mrf.mxu1 }
 0x456   :  { %v1562_v43 = vadd.f32 %v1556_v0, %v1502_v40  ;;  %v1621_v47 = vadd.f32 %v1614_v4, %v1561_v39  ;;  %v2223_v22 = vld [vmem:[%s3199_s4] ss:$2 sm:$0x3] }
 0x457   :  { %v1558_v27 = vpop.f32.mrf.mxu0  ;;  %v1619_v28 = vpop.f32.mrf.mxu1 }
 0x458   :  { %v1622_v51 = vadd.f32 %v1616_v25, %v1562_v43  ;;  %v2227_v25 = vsub.s32 0, %v2226_v18  ;;  %v2231_v27 = vsub.s32 1, %v2226_v18 }
 0x459   :  { %v1559_v31 = vpop.f32.mrf.mxu0  ;;  %v1734_v32 = vpop.f32.mrf.mxu1 }
 0x45a   :  { %v2228_v31 = vrot.slane %v2223_v22, %v2227_v25 }
 0x45b   :  { %v1674_v34 = vpop.f32.mrf.mxu0  ;;  %v1736_v35 = vpop.f32.mrf.mxu1 }
 0x45c   :  { %v1681_v50 = vadd.f32 %v1674_v34, %v1621_v47 }
 0x45d   :  { %v1676_v37 = vpop.f32.mrf.mxu0  ;;  %v1738_v38 = vpop.f32.mrf.mxu1 }
 0x45e   :  { %v1682_v54 = vadd.f32 %v1676_v37, %v1622_v51  ;;  %v1741_v57 = vadd.f32 %v1734_v32, %v1681_v50  ;;  %v2232_v37 = vrot.slane %v2223_v22, %v2231_v27  ;;  %v2273_v50 = vld [vmem:[%s3199_s4 + $0x1] sm:$0x1] }
 0x45f   :  { %v1678_v41 = vpop.f32.mrf.mxu0  ;;  %v1739_v42 = vpop.f32.mrf.mxu1 }
 0x460   :  { %v1742_v61 = vadd.f32 %v1736_v35, %v1682_v54 }
 0x461   :  { %v1679_v44 = vpop.f32.mrf.mxu0  ;;  %v1854_v46 = vpop.f32.mrf.mxu1 }
 0x463   :  { %v1794_v48 = vpop.f32.mrf.mxu0  ;;  %v1856_v49 = vpop.f32.mrf.mxu1 }
 0x464   :  { %v1801_v60 = vadd.f32 %v1794_v48, %v1741_v57 }
 0x465   :  { %v1796_v52 = vpop.f32.mrf.mxu0  ;;  %v1858_v53 = vpop.f32.mrf.mxu1 }
 0x466   :  { %v1802_v1 = vadd.f32 %v1796_v52, %v1742_v61  ;;  %v1861_v5 = vadd.f32 %v1854_v46, %v1801_v60 }
 0x467   :  { %v1798_v55 = vpop.f32.mrf.mxu0  ;;  %v1859_v56 = vpop.f32.mrf.mxu1 }
 0x468   :  { %v1862_v10 = vadd.f32 %v1856_v49, %v1802_v1 }
 0x469   :  { %v1799_v58 = vpop.f32.mrf.mxu0  ;;  %v1974_v59 = vpop.f32.mrf.mxu1 }
 0x46b   :  { %v1914_v62 = vpop.f32.mrf.mxu0  ;;  %v1976_v63 = vpop.f32.mrf.mxu1 }
 0x46c   :  { %v1921_v9 = vadd.f32 %v1914_v62, %v1861_v5 }
 0x46d   :  { %v1916_v2 = vpop.f32.mrf.mxu0  ;;  %v1978_v3 = vpop.f32.mrf.mxu1 }
 0x46e   :  { %v1922_v12 = vadd.f32 %v1916_v2, %v1862_v10  ;;  %v1981_v17 = vadd.f32 %v1974_v59, %v1921_v9 }
 0x46f   :  { %v1918_v6 = vpop.f32.mrf.mxu0  ;;  %v1979_v8 = vpop.f32.mrf.mxu1 }
 0x470   :  { %v1982_v4 = vadd.f32 %v1976_v63, %v1922_v12 }
 0x471   :  { %v1919_v13 = vpop.f32.mrf.mxu0  ;;  %v2094_v14 = vpop.f32.mrf.mxu1 }
 0x473   :  { %v2034_v15 = vpop.f32.mrf.mxu0  ;;  %v2096_v16 = vpop.f32.mrf.mxu1 }
 0x474   :  { %v2041_v7 = vadd.f32 %v2034_v15, %v1981_v17 }
 0x475   :  { %v2036_v19 = vpop.f32.mrf.mxu0  ;;  %v2098_v20 = vpop.f32.mrf.mxu1 }
 0x476   :  { %v2042_v24 = vadd.f32 %v2036_v19, %v1982_v4  ;;  %v2101_v26 = vadd.f32 %v2094_v14, %v2041_v7 }
 0x477   :  { %v2038_v23 = vpop.f32.mrf.mxu0  ;;  %v2099_v21 = vpop.f32.mrf.mxu1 }
 0x478   :  { %v2102_v32 = vadd.f32 %v2096_v16, %v2042_v24 }
 0x479   :  { %v2039_v45 = vpop.f32.mrf.mxu0  ;;  %v2214_v0 = vpop.f32.mrf.mxu1 }
 0x47b   :  { %v2154_v28 = vpop.f32.mrf.mxu0  ;;  %v2216_v29 = vpop.f32.mrf.mxu1 }
 0x47c   :  { %v2161_v30 = vadd.f32 %v2154_v28, %v2101_v26 }
 0x47d   :  { %v2156_v33 = vpop.f32.mrf.mxu0  ;;  %v2218_v34 = vpop.f32.mrf.mxu1 }
 0x47e   :  { %v2221_v35 = vadd.f32 %v2214_v0, %v2161_v30  ;;  %v2162_v36 = vadd.f32 %v2156_v33, %v2102_v32 }
 0x47f   :  { %v2158_v38 = vpop.f32.mrf.mxu0  ;;  %v2219_v39 = vpop.f32.mrf.mxu1 }
 0x480   :  { %v2235_v40 = vadd.f32 %v2228_v31, %v2221_v35  ;;  %v2222_v41 = vadd.f32 %v2216_v29, %v2162_v36 }
 0x481   :  { %v2159_v42 = vpop.f32.mrf.mxu0 }
 0x482   :  { %v2236_v43 = vadd.f32 %v2232_v37, %v2222_v41  ;;  %v2237_v44 = vmax.f32 %v2235_v40, 0.0 }
 0x484   :  { %v2238_v46 = vmax.f32 %v2236_v43, 0.0  ;;  %v2239_v48 = vpack.c.bf16 %v2237_v44, %v2237_v44 }
 0x486   :  { %v2240_v47 = vpack.c.bf16 %v2238_v46, %v2238_v46 }
 0x488   :  { %2402 = vmatprep.mubr.bf16.mxu0 %v2240_v47 }
 0x489   :  { %2403 = vmatmul.mubr.bf16.vlgmr.msra.gmra.mxu0 %v2239_v48 }
 0x549   :  { %v2651_v49 = vpop.f32.mrf.mxu0 }
 0x54b   :  { %v2652_v51 = vpop.f32.mrf.mxu0 }
 0x54c   :  { %v2653_v52 = vadd.f32 %v2652_v51, %v2651_v49 }
 0x54d   :  { %v2654_v53 = vpop.f32.mrf.mxu0 }
 0x54e   :  { %v2405_v54 = vadd.f32 %v2653_v52, %v2273_v50 }
 0x54f   :  { %v2655_v55 = vpop.f32.mrf.mxu0 }
 0x550   :  { %v2620_v56 = vmul.f32 -1.442695, %v2405_v54 }
 0x552   :  { %2773 = vpow2.f32 %v2620_v56 }
 0x55f   :  { %v2774_v57 = vpop.eup %2773 }
 0x560   :  { %v2413_v58 = vadd.f32 1.0, %v2774_v57 }
 0x562   :  { %2775 = vrcp.f32 %v2413_v58 }
 0x56f   :  { %v2776_v59 = vpop.eup %2775 }
 0x570   :  { %2416 = vst [vmem:[#allocation2] sm:$0x1] %v2776_v59 }
 0x571   :  { %2788 = shalt.err (!%p2785_p4)
}
 0x572   :  { %2426 = dma.vmem_to_hbm [thread:$0]  %s2424_s27, 16, %s3201_s6, [#allocation3]  }
 0x573   :  { %2797 = dma.done.wait [#allocation3], 16  }
 0x574   :  { %2798 = vsyncadd [#allocation3], 4294967280 }
 0x575   :  { %2430 = vsyncpa [#allocation3], 1 }

</bundles_post_ra>
